<compile_context>
chip_gen: v5e
topology: v5e:2x2
jax: 0.10.0
libtpu: 0.0.40
codegen_flags: <defaults>
</compile_context>

<pallas_src>
import functools

import jax
import jax.numpy as jnp
from jax.experimental import pallas as pl
from jax.experimental.pallas import tpu as pltpu


# ----------------------------- Pallas kernels ------------------------------


def _linear_ln_kernel(x_ref, w_ref, b_ref, g_ref, beta_ref, o_ref):
    # o = LayerNorm(x @ w + b) * gamma + beta   (eps = 1e-5, biased variance,
    # matching torch.nn.LayerNorm defaults).  bf16 MXU operands, f32 epilogue.
    bf16 = jnp.bfloat16
    y = jnp.dot(x_ref[...].astype(bf16), w_ref[...].astype(bf16),
                preferred_element_type=jnp.float32)
    y = y + b_ref[...]
    mu = jnp.mean(y, axis=-1, keepdims=True)
    var = jnp.mean((y - mu) ** 2, axis=-1, keepdims=True)
    yn = (y - mu) * jax.lax.rsqrt(var + 1e-5)
    o_ref[...] = (yn * g_ref[...] + beta_ref[...]).astype(o_ref.dtype)


def _attn_core(rgb, depth, kv_in, qw, qb, kw, kb, vw, vb, pw, pb,
               o_ref, o_scratch, *, num_heads, scale):
    """Fused q/k/v projections + multi-head attention + output projection.

    rgb:   (N, C)  queries
    depth: (N, C)  depth tokens (pass-through branch of the concat)
    kv_in: (Nk, C) key/value tokens
    writes o_ref[0, :, :] of shape (2N, C)
    """
    bf16 = jnp.bfloat16
    f32 = jnp.float32
    n_rgb, C = rgb.shape
    hd = C // num_heads

    rgb16 = rgb.astype(bf16)
    kv16 = kv_in.astype(bf16)

    # Projections (bf16 MXU, f32 accumulate).  Attention scale folded into q.
    q = jnp.dot(rgb16, qw.astype(bf16), preferred_element_type=f32) + qb
    q = q * scale
    k = jnp.dot(kv16, kw.astype(bf16), preferred_element_type=f32) + kb
    v = jnp.dot(kv16, vw.astype(bf16), preferred_element_type=f32) + vb

    q16 = q.astype(bf16)
    k16 = k.astype(bf16)
    v16 = v.astype(bf16)

    # Per-head attention; heads are static lane slices, outputs written into a
    # lane-dense (N, C) scratch so the final store / proj matmul is full-width.
    for h in range(num_heads):
        sl = slice(h * hd, (h + 1) * hd)
        # s = q_h @ k_h^T  (contract the head_dim axes directly, no transpose)
        s = jax.lax.dot_general(q16[:, sl], k16[:, sl],
                                (((1,), (1,)), ((), ())),
                                preferred_element_type=f32)       # (N, Nk) f32
        s = s - jnp.max(s, axis=-1, keepdims=True)
        p = jnp.exp(s)
        p = p * pl.reciprocal(jnp.sum(p, axis=-1, keepdims=True), approx=True)
        o_scratch[:, sl] = jnp.dot(p.astype(bf16), v16[:, sl],
                                   preferred_element_type=f32)    # (N, hd)

    # Output projection applied to [attn_out ; depth] (== proj(cat) in torch).
    pw16 = pw.astype(bf16)
    attn_out = o_scratch[...]
    o_ref[0, :n_rgb, :] = (jnp.dot(attn_out.astype(bf16), pw16,
                                   preferred_element_type=f32)
                           + pb).astype(o_ref.dtype)
    o_ref[0, n_rgb:, :] = (jnp.dot(depth.astype(bf16), pw16,
                                   preferred_element_type=f32)
                           + pb).astype(o_ref.dtype)


def _cross_attn_sr_kernel(x_ref, kv_ref, qw_ref, qb_ref, kw_ref, kb_ref,
                          vw_ref, vb_ref, pw_ref, pb_ref, o_ref, o_scratch,
                          *, num_heads, scale, n_rgb):
    _attn_core(x_ref[0, :n_rgb, :], x_ref[0, n_rgb:, :], kv_ref[0],
               qw_ref[...], qb_ref[...], kw_ref[...], kb_ref[...],
               vw_ref[...], vb_ref[...], pw_ref[...], pb_ref[...],
               o_ref, o_scratch, num_heads=num_heads, scale=scale)


def _cross_attn_self_kernel(x_ref, qw_ref, qb_ref, kw_ref, kb_ref,
                            vw_ref, vb_ref, pw_ref, pb_ref, o_ref, o_scratch,
                            *, num_heads, scale, n_rgb):
    # sr_ratio == 1: kv comes from the full x (rgb + depth tokens); load x once.
    x = x_ref[0]
    _attn_core(x[:n_rgb, :], x[n_rgb:, :], x,
               qw_ref[...], qb_ref[...], kw_ref[...], kb_ref[...],
               vw_ref[...], vb_ref[...], pw_ref[...], pb_ref[...],
               o_ref, o_scratch, num_heads=num_heads, scale=scale)


# ----------------------------- kernel wrappers ------------------------------


def linear_layernorm(x, w, b, gamma, beta, *, tm=512):
    """x: (M, K), w: (K, N) -> LayerNorm(x @ w + b): (M, N), tiled over M."""
    M, K = x.shape
    N = w.shape[1]
    TM = min(tm, M)
    return pl.pallas_call(
        _linear_ln_kernel,
        out_shape=jax.ShapeDtypeStruct((M, N), x.dtype),
        grid=(pl.cdiv(M, TM),),
        in_specs=[
            pl.BlockSpec((TM, K), lambda i: (i, 0)),
            pl.BlockSpec((K, N), lambda i: (0, 0)),
            pl.BlockSpec((1, N), lambda i: (0, 0)),
            pl.BlockSpec((1, N), lambda i: (0, 0)),
            pl.BlockSpec((1, N), lambda i: (0, 0)),
        ],
        out_specs=pl.BlockSpec((TM, N), lambda i: (i, 0)),
        compiler_params=pltpu.CompilerParams(dimension_semantics=("parallel",)),
    )(x, w, b.reshape(1, N), gamma.reshape(1, N), beta.reshape(1, N))


# ------------------------------ forward pass --------------------------------


@functools.partial(jax.jit, static_argnums=(1, 2, 4, 5))
def cross_attention_forward(x, H, W, params, num_heads, sr_ratio):
    """x: (B, 2N, C) with N = H*W; first N tokens = rgb, last N = depth."""
    B, twoN, C = x.shape
    N = twoN // 2
    head_dim = C // num_heads
    scale = head_dim ** (-0.5)

    # Split kv weights so K and V are produced by two contiguous matmuls.
    k_w = params["kv_w"][:, :C]
    v_w = params["kv_w"][:, C:]
    k_b = params["kv_b"][:C].reshape(1, C)
    v_b = params["kv_b"][C:].reshape(1, C)
    q_b = params["q_b"].reshape(1, C)
    p_b = params["proj_b"].reshape(1, C)

    wspec = pl.BlockSpec((C, C), lambda b: (0, 0))
    bspec = pl.BlockSpec((1, C), lambda b: (0, 0))
    weight_specs = [wspec, bspec, wspec, bspec, wspec, bspec, wspec, bspec]
    weight_args = (params["q_w"], q_b, k_w, k_b, v_w, v_b,
                   params["proj_w"], p_b)

    if sr_ratio > 1:
        sr = sr_ratio
        Hs, Ws = H // sr, W // sr
        Nk = Hs * Ws
        # strided conv (kernel=stride=sr) == non-overlapping patch extract + matmul
        rgb = x[:, :N, :]
        patches = (rgb.reshape(B, Hs, sr, Ws, sr, C)
                      .transpose(0, 1, 3, 2, 4, 5)
                      .reshape(B * Nk, sr * sr * C))
        kv_tokens = linear_layernorm(patches, params["sr_w"], params["sr_b"],
                                     params["ln_g"], params["ln_b"])
        kv_in = kv_tokens.reshape(B, Nk, C)

        kern = functools.partial(_cross_attn_sr_kernel, num_heads=num_heads,
                                 scale=scale, n_rgb=N)
        in_specs = [pl.BlockSpec((1, twoN, C), lambda b: (b, 0, 0)),
                    pl.BlockSpec((1, Nk, C), lambda b: (b, 0, 0))] + weight_specs
        args = (x, kv_in) + weight_args
    else:
        kern = functools.partial(_cross_attn_self_kernel, num_heads=num_heads,
                                 scale=scale, n_rgb=N)
        in_specs = [pl.BlockSpec((1, twoN, C), lambda b: (b, 0, 0))] + weight_specs
        args = (x,) + weight_args

    return pl.pallas_call(
        kern,
        out_shape=jax.ShapeDtypeStruct((B, twoN, C), x.dtype),
        grid=(B,),
        in_specs=in_specs,
        out_specs=pl.BlockSpec((1, twoN, C), lambda b: (b, 0, 0)),
        scratch_shapes=[pltpu.VMEM((N, C), jnp.float32)],
        compiler_params=pltpu.CompilerParams(dimension_semantics=("parallel",)),
    )(*args)


# --------------------------- pure-JAX reference ------------------------------


def reference_forward(x, H, W, params, num_heads, sr_ratio):
    B, twoN, C = x.shape
    N = twoN // 2
    rgb, depth = x[:, :N], x[:, N:]
    hd = C // num_heads
    scale = hd ** (-0.5)
    q = (rgb @ params["q_w"] + params["q_b"]).reshape(B, N, num_heads, hd).transpose(0, 2, 1, 3)
    if sr_ratio > 1:
        sr = sr_ratio
        img = rgb.reshape(B, H, W, C)
        patches = (img.reshape(B, H // sr, sr, W // sr, sr, C)
                      .transpose(0, 1, 3, 2, 4, 5)
                      .reshape(B, -1, sr * sr * C))
        t = patches @ params["sr_w"] + params["sr_b"]
        mu = t.mean(-1, keepdims=True)
        var = ((t - mu) ** 2).mean(-1, keepdims=True)
        kv_in = (t - mu) / jnp.sqrt(var + 1e-5) * params["ln_g"] + params["ln_b"]
    else:
        kv_in = x
    kv = kv_in @ params["kv_w"] + params["kv_b"]
    Nk = kv.shape[1]
    kv = kv.reshape(B, Nk, 2, num_heads, hd).transpose(2, 0, 3, 1, 4)
    k, v = kv[0], kv[1]
    attn = jax.nn.softmax((q @ k.transpose(0, 1, 3, 2)) * scale, axis=-1)
    o = (attn @ v).transpose(0, 2, 1, 3).reshape(B, N, C)
    out = jnp.concatenate([o, depth], axis=1)
    return out @ params["proj_w"] + params["proj_b"]


# --------------------------------- params -----------------------------------


def init_params(key, C, sr_ratio):
    keys = jax.random.split(key, 8)

    def w(k, shape):
        return jax.random.normal(k, shape, jnp.float32) * 0.05

    p = dict(
        q_w=w(keys[0], (C, C)), q_b=w(keys[1], (C,)),            # qkv_bias=True
        kv_w=w(keys[2], (C, 2 * C)), kv_b=w(keys[3], (2 * C,)),
        proj_w=w(keys[4], (C, C)), proj_b=w(keys[5], (C,)),
    )
    if sr_ratio > 1:
        p.update(
            sr_w=w(keys[6], (sr_ratio * sr_ratio * C, C)),  # conv weight, (kh,kw,ci)->co
            sr_b=w(keys[7], (C,)),
            ln_g=jnp.ones((C,), jnp.float32),
            ln_b=jnp.zeros((C,), jnp.float32),
        )
    return p


# ---------------------------------- main -------------------------------------


if __name__ == "__main__":
    key = jax.random.PRNGKey(0)
    B, C, num_heads, H, W = 2, 32, 4, 8, 8      # cfg.dims=32, cfg.num_heads=4
    N = H * W

    for sr_ratio in (2, 1):                     # exercise both branches
        pkey, xkey, key = jax.random.split(key, 3)
        params = init_params(pkey, C, sr_ratio)
        x = jax.random.normal(xkey, (B, 2 * N, C), jnp.float32)

        out = cross_attention_forward(x, H, W, params, num_heads, sr_ratio)
        out = jax.block_until_ready(out)

        ref = reference_forward(x, H, W, params, num_heads, sr_ratio)
        assert out.shape == (B, 2 * N, C)
        # bf16 MXU operands + approx reciprocal => looser tolerance than pure f32.
        assert jnp.allclose(out, ref, atol=2e-2, rtol=2e-2), (
            f"mismatch (sr_ratio={sr_ratio}): "
            f"max abs err {float(jnp.max(jnp.abs(out - ref)))}")

    print("KERNEL_OK")
</pallas_src>

<mosaic_0001>
module attributes {stable_mosaic.version = 11 : i64} {
  func.func @_linear_ln_kernel(%arg0: i32, %arg1: memref<32x128xf32, #tpu.memory_space<vmem>>, %arg2: memref<128x32xf32, #tpu.memory_space<vmem>>, %arg3: memref<1x32xf32, #tpu.memory_space<vmem>>, %arg4: memref<1x32xf32, #tpu.memory_space<vmem>>, %arg5: memref<1x32xf32, #tpu.memory_space<vmem>>, %arg6: memref<32x32xf32, #tpu.memory_space<vmem>>) attributes {dimension_semantics = [#tpu.dimension_semantics<parallel>], iteration_bounds = array<i64: 1>, scalar_prefetch = 0 : i64, scratch_operands = 0 : i64, tpu.core_type = #tpu.core_type<tc>, window_params = [{transform_indices = @transform_0, window_bounds = array<i64: 32, 128>}, {pipeline_mode = #tpu.pipeline_mode<synchronous>, transform_indices = @transform_1, window_bounds = array<i64: 128, 32>}, {pipeline_mode = #tpu.pipeline_mode<synchronous>, transform_indices = @transform_2, window_bounds = array<i64: 1, 32>}, {pipeline_mode = #tpu.pipeline_mode<synchronous>, transform_indices = @transform_3, window_bounds = array<i64: 1, 32>}, {pipeline_mode = #tpu.pipeline_mode<synchronous>, transform_indices = @transform_4, window_bounds = array<i64: 1, 32>}, {transform_indices = @transform_5, window_bounds = array<i64: 32, 32>}]} {
    %c0 = arith.constant 0 : index
    %c0_0 = arith.constant 0 : index
    %0 = vector.load %arg1[%c0, %c0_0] : memref<32x128xf32, #tpu.memory_space<vmem>>, vector<32x128xf32>
    %1 = arith.truncf %0 : vector<32x128xf32> to vector<32x128xbf16>
    %c0_1 = arith.constant 0 : index
    %c0_2 = arith.constant 0 : index
    %2 = vector.load %arg2[%c0_1, %c0_2] : memref<128x32xf32, #tpu.memory_space<vmem>>, vector<128x32xf32>
    %3 = arith.truncf %2 : vector<128x32xf32> to vector<128x32xbf16>
    %cst = arith.constant dense<0.000000e+00> : vector<32x32xf32>
    %4 = tpu.matmul %1, %3, %cst {dimension_numbers = #tpu.dot_dimension_numbers<[1], [0], [0], [1], [0, 0, 1, 1], [], []>} : vector<32x128xbf16>, vector<128x32xbf16>, vector<32x32xf32> -> vector<32x32xf32>
    %c0_3 = arith.constant 0 : index
    %c0_4 = arith.constant 0 : index
    %5 = vector.load %arg3[%c0_3, %c0_4] : memref<1x32xf32, #tpu.memory_space<vmem>>, vector<1x32xf32>
    %6 = vector.broadcast %5 : vector<1x32xf32> to vector<32x32xf32>
    %7 = arith.addf %4, %6 : vector<32x32xf32>
    %cst_5 = arith.constant dense<0.000000e+00> : vector<32xf32>
    %8 = vector.multi_reduction <add>, %7, %cst_5 [1] : vector<32x32xf32> to vector<32xf32>
    %9 = vector.shape_cast %8 : vector<32xf32> to vector<32x1xf32>
    %cst_6 = arith.constant 3.200000e+01 : f32
    %10 = vector.broadcast %cst_6 : f32 to vector<32x1xf32>
    %11 = arith.divf %9, %10 : vector<32x1xf32>
    %12 = vector.broadcast %11 : vector<32x1xf32> to vector<32x32xf32>
    %13 = arith.subf %7, %12 : vector<32x32xf32>
    %14 = arith.mulf %13, %13 : vector<32x32xf32>
    %cst_7 = arith.constant dense<0.000000e+00> : vector<32xf32>
    %15 = vector.multi_reduction <add>, %14, %cst_7 [1] : vector<32x32xf32> to vector<32xf32>
    %16 = vector.shape_cast %15 : vector<32xf32> to vector<32x1xf32>
    %cst_8 = arith.constant 3.200000e+01 : f32
    %17 = vector.broadcast %cst_8 : f32 to vector<32x1xf32>
    %18 = arith.divf %16, %17 : vector<32x1xf32>
    %19 = vector.broadcast %11 : vector<32x1xf32> to vector<32x32xf32>
    %20 = arith.subf %7, %19 : vector<32x32xf32>
    %cst_9 = arith.constant 9.99999974E-6 : f32
    %21 = vector.broadcast %cst_9 : f32 to vector<32x1xf32>
    %22 = arith.addf %18, %21 : vector<32x1xf32>
    %23 = math.rsqrt %22 : vector<32x1xf32>
    %24 = vector.broadcast %23 : vector<32x1xf32> to vector<32x32xf32>
    %25 = arith.mulf %20, %24 : vector<32x32xf32>
    %c0_10 = arith.constant 0 : index
    %c0_11 = arith.constant 0 : index
    %26 = vector.load %arg4[%c0_10, %c0_11] : memref<1x32xf32, #tpu.memory_space<vmem>>, vector<1x32xf32>
    %27 = vector.broadcast %26 : vector<1x32xf32> to vector<32x32xf32>
    %28 = arith.mulf %25, %27 : vector<32x32xf32>
    %c0_12 = arith.constant 0 : index
    %c0_13 = arith.constant 0 : index
    %29 = vector.load %arg5[%c0_12, %c0_13] : memref<1x32xf32, #tpu.memory_space<vmem>>, vector<1x32xf32>
    %30 = vector.broadcast %29 : vector<1x32xf32> to vector<32x32xf32>
    %31 = arith.addf %28, %30 : vector<32x32xf32>
    %c0_14 = arith.constant 0 : index
    %c0_15 = arith.constant 0 : index
    %32 = vector.load %arg6[%c0_14, %c0_15] : memref<32x32xf32, #tpu.memory_space<vmem>>, vector<32x32xf32>
    tpu.vector_store %arg6[%c0_14, %c0_15], %31 {strides = array<i32>} : memref<32x32xf32, #tpu.memory_space<vmem>>, vector<32x32xf32>,
    return
  }
  func.func @transform_0(%arg0: i32) -> (i32, i32) {
    %c0_i32 = arith.constant 0 : i32
    %c0_i32_0 = arith.constant 0 : i32
    return %arg0, %c0_i32 : i32, i32
  }
  func.func @transform_1(%arg0: i32) -> (i32, i32) {
    %c0_i32 = arith.constant 0 : i32
    %c0_i32_0 = arith.constant 0 : i32
    %c0_i32_1 = arith.constant 0 : i32
    return %c0_i32, %c0_i32_0 : i32, i32
  }
  func.func @transform_2(%arg0: i32) -> (i32, i32) {
    %c0_i32 = arith.constant 0 : i32
    %c0_i32_0 = arith.constant 0 : i32
    %c0_i32_1 = arith.constant 0 : i32
    return %c0_i32, %c0_i32_0 : i32, i32
  }
  func.func @transform_3(%arg0: i32) -> (i32, i32) {
    %c0_i32 = arith.constant 0 : i32
    %c0_i32_0 = arith.constant 0 : i32
    %c0_i32_1 = arith.constant 0 : i32
    return %c0_i32, %c0_i32_0 : i32, i32
  }
  func.func @transform_4(%arg0: i32) -> (i32, i32) {
    %c0_i32 = arith.constant 0 : i32
    %c0_i32_0 = arith.constant 0 : i32
    %c0_i32_1 = arith.constant 0 : i32
    return %c0_i32, %c0_i32_0 : i32, i32
  }
  func.func @transform_5(%arg0: i32) -> (i32, i32) {
    %c0_i32 = arith.constant 0 : i32
    %c0_i32_0 = arith.constant 0 : i32
    return %arg0, %c0_i32 : i32, i32
  }
}

module attributes {stable_mosaic.version = 11 : i64} {
  func.func @_cross_attn_sr_kernel(%arg0: i32, %arg1: memref<1x128x32xf32, #tpu.memory_space<vmem>>, %arg2: memref<1x16x32xf32, #tpu.memory_space<vmem>>, %arg3: memref<32x32xf32, #tpu.memory_space<vmem>>, %arg4: memref<1x32xf32, #tpu.memory_space<vmem>>, %arg5: memref<32x32xf32, #tpu.memory_space<vmem>>, %arg6: memref<1x32xf32, #tpu.memory_space<vmem>>, %arg7: memref<32x32xf32, #tpu.memory_space<vmem>>, %arg8: memref<1x32xf32, #tpu.memory_space<vmem>>, %arg9: memref<32x32xf32, #tpu.memory_space<vmem>>, %arg10: memref<1x32xf32, #tpu.memory_space<vmem>>, %arg11: memref<1x128x32xf32, #tpu.memory_space<vmem>>, %arg12: memref<64x32xf32, #tpu.memory_space<vmem>>) attributes {dimension_semantics = [#tpu.dimension_semantics<parallel>], iteration_bounds = array<i64: 2>, scalar_prefetch = 0 : i64, scratch_operands = 1 : i64, tpu.core_type = #tpu.core_type<tc>, window_params = [{transform_indices = @transform_0, window_bounds = array<i64: 1, 128, 32>}, {transform_indices = @transform_1, window_bounds = array<i64: 1, 16, 32>}, {pipeline_mode = #tpu.pipeline_mode<synchronous>, transform_indices = @transform_2, window_bounds = array<i64: 32, 32>}, {pipeline_mode = #tpu.pipeline_mode<synchronous>, transform_indices = @transform_3, window_bounds = array<i64: 1, 32>}, {pipeline_mode = #tpu.pipeline_mode<synchronous>, transform_indices = @transform_4, window_bounds = array<i64: 32, 32>}, {pipeline_mode = #tpu.pipeline_mode<synchronous>, transform_indices = @transform_5, window_bounds = array<i64: 1, 32>}, {pipeline_mode = #tpu.pipeline_mode<synchronous>, transform_indices = @transform_6, window_bounds = array<i64: 32, 32>}, {pipeline_mode = #tpu.pipeline_mode<synchronous>, transform_indices = @transform_7, window_bounds = array<i64: 1, 32>}, {pipeline_mode = #tpu.pipeline_mode<synchronous>, transform_indices = @transform_8, window_bounds = array<i64: 32, 32>}, {pipeline_mode = #tpu.pipeline_mode<synchronous>, transform_indices = @transform_9, window_bounds = array<i64: 1, 32>}, {transform_indices = @transform_10, window_bounds = array<i64: 1, 128, 32>}]} {
    %c0 = arith.constant 0 : index
    %c0_0 = arith.constant 0 : index
    %c0_1 = arith.constant 0 : index
    %0 = vector.load %arg1[%c0, %c0_0, %c0_1] : memref<1x128x32xf32, #tpu.memory_space<vmem>>, vector<1x64x32xf32>
    %1 = vector.shape_cast %0 : vector<1x64x32xf32> to vector<64x32xf32>
    %c0_2 = arith.constant 0 : index
    %c64 = arith.constant 64 : index
    %c0_3 = arith.constant 0 : index
    %2 = vector.load %arg1[%c0_2, %c64, %c0_3] : memref<1x128x32xf32, #tpu.memory_space<vmem>>, vector<1x64x32xf32>
    %3 = vector.shape_cast %2 : vector<1x64x32xf32> to vector<64x32xf32>
    %c0_4 = arith.constant 0 : index
    %c0_5 = arith.constant 0 : index
    %c0_6 = arith.constant 0 : index
    %4 = vector.load %arg2[%c0_4, %c0_5, %c0_6] : memref<1x16x32xf32, #tpu.memory_space<vmem>>, vector<1x16x32xf32>
    %5 = vector.shape_cast %4 : vector<1x16x32xf32> to vector<16x32xf32>
    %c0_7 = arith.constant 0 : index
    %c0_8 = arith.constant 0 : index
    %6 = vector.load %arg3[%c0_7, %c0_8] : memref<32x32xf32, #tpu.memory_space<vmem>>, vector<32x32xf32>
    %c0_9 = arith.constant 0 : index
    %c0_10 = arith.constant 0 : index
    %7 = vector.load %arg4[%c0_9, %c0_10] : memref<1x32xf32, #tpu.memory_space<vmem>>, vector<1x32xf32>
    %c0_11 = arith.constant 0 : index
    %c0_12 = arith.constant 0 : index
    %8 = vector.load %arg5[%c0_11, %c0_12] : memref<32x32xf32, #tpu.memory_space<vmem>>, vector<32x32xf32>
    %c0_13 = arith.constant 0 : index
    %c0_14 = arith.constant 0 : index
    %9 = vector.load %arg6[%c0_13, %c0_14] : memref<1x32xf32, #tpu.memory_space<vmem>>, vector<1x32xf32>
    %c0_15 = arith.constant 0 : index
    %c0_16 = arith.constant 0 : index
    %10 = vector.load %arg7[%c0_15, %c0_16] : memref<32x32xf32, #tpu.memory_space<vmem>>, vector<32x32xf32>
    %c0_17 = arith.constant 0 : index
    %c0_18 = arith.constant 0 : index
    %11 = vector.load %arg8[%c0_17, %c0_18] : memref<1x32xf32, #tpu.memory_space<vmem>>, vector<1x32xf32>
    %c0_19 = arith.constant 0 : index
    %c0_20 = arith.constant 0 : index
    %12 = vector.load %arg9[%c0_19, %c0_20] : memref<32x32xf32, #tpu.memory_space<vmem>>, vector<32x32xf32>
    %c0_21 = arith.constant 0 : index
    %c0_22 = arith.constant 0 : index
    %13 = vector.load %arg10[%c0_21, %c0_22] : memref<1x32xf32, #tpu.memory_space<vmem>>, vector<1x32xf32>
    %14 = arith.truncf %1 : vector<64x32xf32> to vector<64x32xbf16>
    %15 = arith.truncf %5 : vector<16x32xf32> to vector<16x32xbf16>
    %16 = arith.truncf %6 : vector<32x32xf32> to vector<32x32xbf16>
    %cst = arith.constant dense<0.000000e+00> : vector<64x32xf32>
    %17 = tpu.matmul %14, %16, %cst {dimension_numbers = #tpu.dot_dimension_numbers<[1], [0], [0], [1], [0, 0, 1, 1], [], []>} : vector<64x32xbf16>, vector<32x32xbf16>, vector<64x32xf32> -> vector<64x32xf32>
    %18 = vector.broadcast %7 : vector<1x32xf32> to vector<64x32xf32>
    %19 = arith.addf %17, %18 : vector<64x32xf32>
    %cst_23 = arith.constant 0.353553385 : f32
    %20 = vector.broadcast %cst_23 : f32 to vector<64x32xf32>
    %21 = arith.mulf %19, %20 : vector<64x32xf32>
    %22 = arith.truncf %8 : vector<32x32xf32> to vector<32x32xbf16>
    %cst_24 = arith.constant dense<0.000000e+00> : vector<16x32xf32>
    %23 = tpu.matmul %15, %22, %cst_24 {dimension_numbers = #tpu.dot_dimension_numbers<[1], [0], [0], [1], [0, 0, 1, 1], [], []>} : vector<16x32xbf16>, vector<32x32xbf16>, vector<16x32xf32> -> vector<16x32xf32>
    %24 = vector.broadcast %9 : vector<1x32xf32> to vector<16x32xf32>
    %25 = arith.addf %23, %24 : vector<16x32xf32>
    %26 = arith.truncf %10 : vector<32x32xf32> to vector<32x32xbf16>
    %cst_25 = arith.constant dense<0.000000e+00> : vector<16x32xf32>
    %27 = tpu.matmul %15, %26, %cst_25 {dimension_numbers = #tpu.dot_dimension_numbers<[1], [0], [0], [1], [0, 0, 1, 1], [], []>} : vector<16x32xbf16>, vector<32x32xbf16>, vector<16x32xf32> -> vector<16x32xf32>
    %28 = vector.broadcast %11 : vector<1x32xf32> to vector<16x32xf32>
    %29 = arith.addf %27, %28 : vector<16x32xf32>
    %30 = arith.truncf %21 : vector<64x32xf32> to vector<64x32xbf16>
    %31 = arith.truncf %25 : vector<16x32xf32> to vector<16x32xbf16>
    %32 = arith.truncf %29 : vector<16x32xf32> to vector<16x32xbf16>
    %33 = vector.extract_strided_slice %30 {offsets = [0, 0], sizes = [64, 8], strides = [1, 1]} : vector<64x32xbf16> to vector<64x8xbf16>
    %34 = vector.extract_strided_slice %31 {offsets = [0, 0], sizes = [16, 8], strides = [1, 1]} : vector<16x32xbf16> to vector<16x8xbf16>
    %cst_26 = arith.constant dense<0.000000e+00> : vector<64x16xf32>
    %35 = tpu.matmul %33, %34, %cst_26 {dimension_numbers = #tpu.dot_dimension_numbers<[1], [1], [0], [0], [0, 0, 1, 0], [], []>} : vector<64x8xbf16>, vector<16x8xbf16>, vector<64x16xf32> -> vector<64x16xf32>
    %cst_27 = arith.constant dense<0xFF800000> : vector<64xf32>
    %36 = vector.multi_reduction <maximumf>, %35, %cst_27 [1] : vector<64x16xf32> to vector<64xf32>
    %37 = vector.shape_cast %36 : vector<64xf32> to vector<64x1xf32>
    %38 = vector.broadcast %37 : vector<64x1xf32> to vector<64x16xf32>
    %39 = arith.subf %35, %38 : vector<64x16xf32>
    %40 = math.exp %39 : vector<64x16xf32>
    %cst_28 = arith.constant dense<0.000000e+00> : vector<64xf32>
    %41 = vector.multi_reduction <add>, %40, %cst_28 [1] : vector<64x16xf32> to vector<64xf32>
    %42 = vector.shape_cast %41 : vector<64xf32> to vector<64x1xf32>
    %43 = tpu.reciprocal %42 {approx = true} : vector<64x1xf32> -> vector<64x1xf32>
    %44 = vector.broadcast %43 : vector<64x1xf32> to vector<64x16xf32>
    %45 = arith.mulf %40, %44 : vector<64x16xf32>
    %46 = arith.truncf %45 : vector<64x16xf32> to vector<64x16xbf16>
    %47 = vector.extract_strided_slice %32 {offsets = [0, 0], sizes = [16, 8], strides = [1, 1]} : vector<16x32xbf16> to vector<16x8xbf16>
    %cst_29 = arith.constant dense<0.000000e+00> : vector<64x8xf32>
    %48 = tpu.matmul %46, %47, %cst_29 {dimension_numbers = #tpu.dot_dimension_numbers<[1], [0], [0], [1], [0, 0, 1, 1], [], []>} : vector<64x16xbf16>, vector<16x8xbf16>, vector<64x8xf32> -> vector<64x8xf32>
    %c0_30 = arith.constant 0 : index
    %c0_31 = arith.constant 0 : index
    %49 = vector.load %arg12[%c0_30, %c0_31] : memref<64x32xf32, #tpu.memory_space<vmem>>, vector<64x8xf32>
    tpu.vector_store %arg12[%c0_30, %c0_31], %48 {strides = array<i32>} : memref<64x32xf32, #tpu.memory_space<vmem>>, vector<64x8xf32>,
    %50 = vector.extract_strided_slice %30 {offsets = [0, 8], sizes = [64, 8], strides = [1, 1]} : vector<64x32xbf16> to vector<64x8xbf16>
    %51 = vector.extract_strided_slice %31 {offsets = [0, 8], sizes = [16, 8], strides = [1, 1]} : vector<16x32xbf16> to vector<16x8xbf16>
    %cst_32 = arith.constant dense<0.000000e+00> : vector<64x16xf32>
    %52 = tpu.matmul %50, %51, %cst_32 {dimension_numbers = #tpu.dot_dimension_numbers<[1], [1], [0], [0], [0, 0, 1, 0], [], []>} : vector<64x8xbf16>, vector<16x8xbf16>, vector<64x16xf32> -> vector<64x16xf32>
    %cst_33 = arith.constant dense<0xFF800000> : vector<64xf32>
    %53 = vector.multi_reduction <maximumf>, %52, %cst_33 [1] : vector<64x16xf32> to vector<64xf32>
    %54 = vector.shape_cast %53 : vector<64xf32> to vector<64x1xf32>
    %55 = vector.broadcast %54 : vector<64x1xf32> to vector<64x16xf32>
    %56 = arith.subf %52, %55 : vector<64x16xf32>
    %57 = math.exp %56 : vector<64x16xf32>
    %cst_34 = arith.constant dense<0.000000e+00> : vector<64xf32>
    %58 = vector.multi_reduction <add>, %57, %cst_34 [1] : vector<64x16xf32> to vector<64xf32>
    %59 = vector.shape_cast %58 : vector<64xf32> to vector<64x1xf32>
    %60 = tpu.reciprocal %59 {approx = true} : vector<64x1xf32> -> vector<64x1xf32>
    %61 = vector.broadcast %60 : vector<64x1xf32> to vector<64x16xf32>
    %62 = arith.mulf %57, %61 : vector<64x16xf32>
    %63 = arith.truncf %62 : vector<64x16xf32> to vector<64x16xbf16>
    %64 = vector.extract_strided_slice %32 {offsets = [0, 8], sizes = [16, 8], strides = [1, 1]} : vector<16x32xbf16> to vector<16x8xbf16>
    %cst_35 = arith.constant dense<0.000000e+00> : vector<64x8xf32>
    %65 = tpu.matmul %63, %64, %cst_35 {dimension_numbers = #tpu.dot_dimension_numbers<[1], [0], [0], [1], [0, 0, 1, 1], [], []>} : vector<64x16xbf16>, vector<16x8xbf16>, vector<64x8xf32> -> vector<64x8xf32>
    %c0_36 = arith.constant 0 : index
    %c8 = arith.constant 8 : index
    %66 = vector.load %arg12[%c0_36, %c8] : memref<64x32xf32, #tpu.memory_space<vmem>>, vector<64x8xf32>
    tpu.vector_store %arg12[%c0_36, %c8], %65 {strides = array<i32>} : memref<64x32xf32, #tpu.memory_space<vmem>>, vector<64x8xf32>,
    %67 = vector.extract_strided_slice %30 {offsets = [0, 16], sizes = [64, 8], strides = [1, 1]} : vector<64x32xbf16> to vector<64x8xbf16>
    %68 = vector.extract_strided_slice %31 {offsets = [0, 16], sizes = [16, 8], strides = [1, 1]} : vector<16x32xbf16> to vector<16x8xbf16>
    %cst_37 = arith.constant dense<0.000000e+00> : vector<64x16xf32>
    %69 = tpu.matmul %67, %68, %cst_37 {dimension_numbers = #tpu.dot_dimension_numbers<[1], [1], [0], [0], [0, 0, 1, 0], [], []>} : vector<64x8xbf16>, vector<16x8xbf16>, vector<64x16xf32> -> vector<64x16xf32>
    %cst_38 = arith.constant dense<0xFF800000> : vector<64xf32>
    %70 = vector.multi_reduction <maximumf>, %69, %cst_38 [1] : vector<64x16xf32> to vector<64xf32>
    %71 = vector.shape_cast %70 : vector<64xf32> to vector<64x1xf32>
    %72 = vector.broadcast %71 : vector<64x1xf32> to vector<64x16xf32>
    %73 = arith.subf %69, %72 : vector<64x16xf32>
    %74 = math.exp %73 : vector<64x16xf32>
    %cst_39 = arith.constant dense<0.000000e+00> : vector<64xf32>
    %75 = vector.multi_reduction <add>, %74, %cst_39 [1] : vector<64x16xf32> to vector<64xf32>
    %76 = vector.shape_cast %75 : vector<64xf32> to vector<64x1xf32>
    %77 = tpu.reciprocal %76 {approx = true} : vector<64x1xf32> -> vector<64x1xf32>
    %78 = vector.broadcast %77 : vector<64x1xf32> to vector<64x16xf32>
    %79 = arith.mulf %74, %78 : vector<64x16xf32>
    %80 = arith.truncf %79 : vector<64x16xf32> to vector<64x16xbf16>
    %81 = vector.extract_strided_slice %32 {offsets = [0, 16], sizes = [16, 8], strides = [1, 1]} : vector<16x32xbf16> to vector<16x8xbf16>
    %cst_40 = arith.constant dense<0.000000e+00> : vector<64x8xf32>
    %82 = tpu.matmul %80, %81, %cst_40 {dimension_numbers = #tpu.dot_dimension_numbers<[1], [0], [0], [1], [0, 0, 1, 1], [], []>} : vector<64x16xbf16>, vector<16x8xbf16>, vector<64x8xf32> -> vector<64x8xf32>
    %c0_41 = arith.constant 0 : index
    %c16 = arith.constant 16 : index
    %83 = vector.load %arg12[%c0_41, %c16] : memref<64x32xf32, #tpu.memory_space<vmem>>, vector<64x8xf32>
    tpu.vector_store %arg12[%c0_41, %c16], %82 {strides = array<i32>} : memref<64x32xf32, #tpu.memory_space<vmem>>, vector<64x8xf32>,
    %84 = vector.extract_strided_slice %30 {offsets = [0, 24], sizes = [64, 8], strides = [1, 1]} : vector<64x32xbf16> to vector<64x8xbf16>
    %85 = vector.extract_strided_slice %31 {offsets = [0, 24], sizes = [16, 8], strides = [1, 1]} : vector<16x32xbf16> to vector<16x8xbf16>
    %cst_42 = arith.constant dense<0.000000e+00> : vector<64x16xf32>
    %86 = tpu.matmul %84, %85, %cst_42 {dimension_numbers = #tpu.dot_dimension_numbers<[1], [1], [0], [0], [0, 0, 1, 0], [], []>} : vector<64x8xbf16>, vector<16x8xbf16>, vector<64x16xf32> -> vector<64x16xf32>
    %cst_43 = arith.constant dense<0xFF800000> : vector<64xf32>
    %87 = vector.multi_reduction <maximumf>, %86, %cst_43 [1] : vector<64x16xf32> to vector<64xf32>
    %88 = vector.shape_cast %87 : vector<64xf32> to vector<64x1xf32>
    %89 = vector.broadcast %88 : vector<64x1xf32> to vector<64x16xf32>
    %90 = arith.subf %86, %89 : vector<64x16xf32>
    %91 = math.exp %90 : vector<64x16xf32>
    %cst_44 = arith.constant dense<0.000000e+00> : vector<64xf32>
    %92 = vector.multi_reduction <add>, %91, %cst_44 [1] : vector<64x16xf32> to vector<64xf32>
    %93 = vector.shape_cast %92 : vector<64xf32> to vector<64x1xf32>
    %94 = tpu.reciprocal %93 {approx = true} : vector<64x1xf32> -> vector<64x1xf32>
    %95 = vector.broadcast %94 : vector<64x1xf32> to vector<64x16xf32>
    %96 = arith.mulf %91, %95 : vector<64x16xf32>
    %97 = arith.truncf %96 : vector<64x16xf32> to vector<64x16xbf16>
    %98 = vector.extract_strided_slice %32 {offsets = [0, 24], sizes = [16, 8], strides = [1, 1]} : vector<16x32xbf16> to vector<16x8xbf16>
    %cst_45 = arith.constant dense<0.000000e+00> : vector<64x8xf32>
    %99 = tpu.matmul %97, %98, %cst_45 {dimension_numbers = #tpu.dot_dimension_numbers<[1], [0], [0], [1], [0, 0, 1, 1], [], []>} : vector<64x16xbf16>, vector<16x8xbf16>, vector<64x8xf32> -> vector<64x8xf32>
    %c0_46 = arith.constant 0 : index
    %c24 = arith.constant 24 : index
    %100 = vector.load %arg12[%c0_46, %c24] : memref<64x32xf32, #tpu.memory_space<vmem>>, vector<64x8xf32>
    tpu.vector_store %arg12[%c0_46, %c24], %99 {strides = array<i32>} : memref<64x32xf32, #tpu.memory_space<vmem>>, vector<64x8xf32>,
    %101 = arith.truncf %12 : vector<32x32xf32> to vector<32x32xbf16>
    %c0_47 = arith.constant 0 : index
    %c0_48 = arith.constant 0 : index
    %102 = vector.load %arg12[%c0_47, %c0_48] : memref<64x32xf32, #tpu.memory_space<vmem>>, vector<64x32xf32>
    %103 = arith.truncf %102 : vector<64x32xf32> to vector<64x32xbf16>
    %cst_49 = arith.constant dense<0.000000e+00> : vector<64x32xf32>
    %104 = tpu.matmul %103, %101, %cst_49 {dimension_numbers = #tpu.dot_dimension_numbers<[1], [0], [0], [1], [0, 0, 1, 1], [], []>} : vector<64x32xbf16>, vector<32x32xbf16>, vector<64x32xf32> -> vector<64x32xf32>
    %105 = vector.broadcast %13 : vector<1x32xf32> to vector<64x32xf32>
    %106 = arith.addf %104, %105 : vector<64x32xf32>
    %c0_50 = arith.constant 0 : index
    %c0_51 = arith.constant 0 : index
    %c0_52 = arith.constant 0 : index
    %107 = vector.load %arg11[%c0_50, %c0_51, %c0_52] : memref<1x128x32xf32, #tpu.memory_space<vmem>>, vector<1x64x32xf32>
    %108 = vector.shape_cast %107 : vector<1x64x32xf32> to vector<64x32xf32>
    %109 = vector.shape_cast %106 : vector<64x32xf32> to vector<1x64x32xf32>
    tpu.vector_store %arg11[%c0_50, %c0_51, %c0_52], %109 {strides = array<i32>} : memref<1x128x32xf32, #tpu.memory_space<vmem>>, vector<1x64x32xf32>,
    %110 = arith.truncf %3 : vector<64x32xf32> to vector<64x32xbf16>
    %cst_53 = arith.constant dense<0.000000e+00> : vector<64x32xf32>
    %111 = tpu.matmul %110, %101, %cst_53 {dimension_numbers = #tpu.dot_dimension_numbers<[1], [0], [0], [1], [0, 0, 1, 1], [], []>} : vector<64x32xbf16>, vector<32x32xbf16>, vector<64x32xf32> -> vector<64x32xf32>
    %112 = vector.broadcast %13 : vector<1x32xf32> to vector<64x32xf32>
    %113 = arith.addf %111, %112 : vector<64x32xf32>
    %c0_54 = arith.constant 0 : index
    %c64_55 = arith.constant 64 : index
    %c0_56 = arith.constant 0 : index
    %114 = vector.load %arg11[%c0_54, %c64_55, %c0_56] : memref<1x128x32xf32, #tpu.memory_space<vmem>>, vector<1x64x32xf32>
    %115 = vector.shape_cast %114 : vector<1x64x32xf32> to vector<64x32xf32>
    %116 = vector.shape_cast %113 : vector<64x32xf32> to vector<1x64x32xf32>
    tpu.vector_store %arg11[%c0_54, %c64_55, %c0_56], %116 {strides = array<i32>} : memref<1x128x32xf32, #tpu.memory_space<vmem>>, vector<1x64x32xf32>,
    return
  }
  func.func @transform_0(%arg0: i32) -> (i32, i32, i32) {
    %c0_i32 = arith.constant 0 : i32
    %c0_i32_0 = arith.constant 0 : i32
    %c0_i32_1 = arith.constant 0 : i32
    return %arg0, %c0_i32, %c0_i32_0 : i32, i32, i32
  }
  func.func @transform_1(%arg0: i32) -> (i32, i32, i32) {
    %c0_i32 = arith.constant 0 : i32
    %c0_i32_0 = arith.constant 0 : i32
    %c0_i32_1 = arith.constant 0 : i32
    return %arg0, %c0_i32, %c0_i32_0 : i32, i32, i32
  }
  func.func @transform_2(%arg0: i32) -> (i32, i32) {
    %c0_i32 = arith.constant 0 : i32
    %c0_i32_0 = arith.constant 0 : i32
    %c0_i32_1 = arith.constant 0 : i32
    return %c0_i32, %c0_i32_0 : i32, i32
  }
  func.func @transform_3(%arg0: i32) -> (i32, i32) {
    %c0_i32 = arith.constant 0 : i32
    %c0_i32_0 = arith.constant 0 : i32
    %c0_i32_1 = arith.constant 0 : i32
    return %c0_i32, %c0_i32_0 : i32, i32
  }
  func.func @transform_4(%arg0: i32) -> (i32, i32) {
    %c0_i32 = arith.constant 0 : i32
    %c0_i32_0 = arith.constant 0 : i32
    %c0_i32_1 = arith.constant 0 : i32
    return %c0_i32, %c0_i32_0 : i32, i32
  }
  func.func @transform_5(%arg0: i32) -> (i32, i32) {
    %c0_i32 = arith.constant 0 : i32
    %c0_i32_0 = arith.constant 0 : i32
    %c0_i32_1 = arith.constant 0 : i32
    return %c0_i32, %c0_i32_0 : i32, i32
  }
  func.func @transform_6(%arg0: i32) -> (i32, i32) {
    %c0_i32 = arith.constant 0 : i32
    %c0_i32_0 = arith.constant 0 : i32
    %c0_i32_1 = arith.constant 0 : i32
    return %c0_i32, %c0_i32_0 : i32, i32
  }
  func.func @transform_7(%arg0: i32) -> (i32, i32) {
    %c0_i32 = arith.constant 0 : i32
    %c0_i32_0 = arith.constant 0 : i32
    %c0_i32_1 = arith.constant 0 : i32
    return %c0_i32, %c0_i32_0 : i32, i32
  }
  func.func @transform_8(%arg0: i32) -> (i32, i32) {
    %c0_i32 = arith.constant 0 : i32
    %c0_i32_0 = arith.constant 0 : i32
    %c0_i32_1 = arith.constant 0 : i32
    return %c0_i32, %c0_i32_0 : i32, i32
  }
  func.func @transform_9(%arg0: i32) -> (i32, i32) {
    %c0_i32 = arith.constant 0 : i32
    %c0_i32_0 = arith.constant 0 : i32
    %c0_i32_1 = arith.constant 0 : i32
    return %c0_i32, %c0_i32_0 : i32, i32
  }
  func.func @transform_10(%arg0: i32) -> (i32, i32, i32) {
    %c0_i32 = arith.constant 0 : i32
    %c0_i32_0 = arith.constant 0 : i32
    %c0_i32_1 = arith.constant 0 : i32
    return %arg0, %c0_i32, %c0_i32_0 : i32, i32, i32
  }
}

</mosaic_0001>

<bundles_post_ra>
// kernel: cross_attention_forward.2
= control target key start
LH: loop header
LB: loop body
LE: loop exit
PB: predicated region body
PF: predicated region fallthrough
CT: control target
= control target key end

     0   :  { %vm73_vm0 = vcmask 261120   ;;  %v215_v43 = vmov 32.0   ;;  %s354_s1 = inlined_call_operand.vmem [shape: f32[128,32], index: 1, kind: input, shape index: {}]   ;;  %s355_s2 = inlined_call_operand.vmem [shape: f32[1,32], index: 2, kind: input, shape index: {}]   ;;  %s356_s0 = inlined_call_operand.vmem [shape: f32[32,128], index: 0, kind: input, shape index: {}]   ;;  %s357_s3 = inlined_call_operand.vmem [shape: f32[1,32], index: 3, kind: input, shape index: {}]   ;;  %s358_s4 = inlined_call_operand.vmem [shape: f32[1,32], index: 4, kind: input, shape index: {}]   ;;  %s359_s5 = inlined_call_operand.vmem [shape: f32[32,32], index: 5, kind: output, shape index: {}]  }
   0x1   :  { %v40_v0 = vld [vmem:[%s354_s1 + $0x70] sm:$0xff]  ;;  %v41_v1 = vld [vmem:[%s354_s1 + $0x78] sm:$0xff]  ;;  %v38_v2 = vld [vmem:[%s354_s1 + $0x60] sm:$0xff]  ;;  %205 = vrcp.f32 %v215_v43 }
   0x2   :  { %v49_v3 = vpack.c.bf16 %v41_v1, %v40_v0  ;;  %v39_v4 = vld [vmem:[%s354_s1 + $0x68] sm:$0xff]  ;;  %v36_v6 = vld [vmem:[%s354_s1 + $0x50] sm:$0xff]  ;;  %v37_v7 = vld [vmem:[%s354_s1 + $0x58] sm:$0xff] }
   0x3   :  { %v48_v5 = vpack.c.bf16 %v39_v4, %v38_v2  ;;  %v47_v8 = vpack.c.bf16 %v37_v7, %v36_v6  ;;  %v34_v9 = vld [vmem:[%s354_s1 + $0x40] sm:$0xff]  ;;  %v35_v10 = vld [vmem:[%s354_s1 + $0x48] sm:$0xff]  ;;  %v32_v12 = vld [vmem:[%s354_s1 + $0x30] sm:$0xff] }
   0x4   :  { %54 = vmatpush.bf16.msra.mxu0 %v49_v3  ;;  %193 = vmatpush.bf16.msra.mxu1 %v49_v3  ;;  %v46_v11 = vpack.c.bf16 %v35_v10, %v34_v9  ;;  %v33_v13 = vld [vmem:[%s354_s1 + $0x38] sm:$0xff]  ;;  %v30_v15 = vld [vmem:[%s354_s1 + $0x20] sm:$0xff]  ;;  %v31_v16 = vld [vmem:[%s354_s1 + $0x28] sm:$0xff] }
   0x5   :  { %v45_v14 = vpack.c.bf16 %v33_v13, %v32_v12  ;;  %v44_v17 = vpack.c.bf16 %v31_v16, %v30_v15  ;;  %v28_v18 = vld [vmem:[%s354_s1 + $0x10] sm:$0xff]  ;;  %v29_v19 = vld [vmem:[%s354_s1 + $0x18] sm:$0xff]  ;;  %v26_v21 = vld [vmem:[%s354_s1] sm:$0xff] }
   0x6   :  { %v43_v20 = vpack.c.bf16 %v29_v19, %v28_v18  ;;  %v27_v22 = vld [vmem:[%s354_s1 + $0x8] sm:$0xff]  ;;  %v20_v23 = vld [vmem:[%s356_s0] sm:$0xff]  ;;  %v22_v26 = vld [vmem:[%s356_s0 + $0x10] sm:$0xff] }
   0x7   :  { %v42_v24 = vpack.c.bf16 %v27_v22, %v26_v21  ;;  %v21_v25 = vld [vmem:[%s356_s0 + $0x8] sm:$0xff]  ;;  %v23_v27 = vld [vmem:[%s356_s0 + $0x18] sm:$0xff]  ;;  %v202_v30 = vld [vmem:[%s355_s2] ss:$0 sm:$0xff]  ;;  %v206_v44 = vpop.eup %205 }
   0x8   :  { %55 = vmatpush.bf16.msra.mxu0 %v48_v5  ;;  %194 = vmatpush.bf16.msra.mxu1 %v48_v5  ;;  %v24_v28 = vpack.c.bf16 %v21_v25, %v20_v23  ;;  %v25_v29 = vpack.c.bf16 %v23_v27, %v22_v26  ;;  %v87_v45 = vmul.f32 32.0, %v206_v44  ;;  %vm91_vm1 = vweird.f32 %v206_v44 }
   0xa   :  { %v88_v46 = vsub.f32 1.0, %v87_v45 }
   0xc   :  { %56 = vmatpush.bf16.msra.mxu0 %v47_v8  ;;  %195 = vmatpush.bf16.msra.mxu1 %v47_v8  ;;  %v89_v47 = vmul.f32 %v206_v44, %v88_v46 }
   0xe   :  { %v90_v48 = vadd.f32 %v206_v44, %v89_v47 }
  0x10   :  { %57 = vmatpush.bf16.msra.mxu0 %v46_v11  ;;  %196 = vmatpush.bf16.msra.mxu1 %v46_v11  ;;  %v92_v49 = vsel %vm91_vm1, %v206_v44, %v90_v48 }
  0x14   :  { %58 = vmatpush.bf16.msra.mxu0 %v45_v14  ;;  %197 = vmatpush.bf16.msra.mxu1 %v45_v14 }
  0x18   :  { %59 = vmatpush.bf16.msra.mxu0 %v44_v17  ;;  %198 = vmatpush.bf16.msra.mxu1 %v44_v17 }
  0x1c   :  { %60 = vmatpush.bf16.msra.mxu0 %v43_v20  ;;  %199 = vmatpush.bf16.msra.mxu1 %v43_v20 }
  0x20   :  { %61 = vmatpush.bf16.msra.mxu0 %v42_v24  ;;  %200 = vmatpush.bf16.msra.mxu1 %v42_v24 }
  0x23   :  { %62 = vmatmul.bf16.vlgmr.msra.gmra.mxu0 %v24_v28  ;;  %67 = vmatmul.bf16.vlgmr.msra.gmra.mxu1 %v25_v29 }
  0xa0   :  { %v63_v31 = vpop.f32.mrf.mxu0  ;;  %v68_v32 = vpop.f32.mrf.mxu1 }
  0xa1   :  { %v64_v33 = vadd.f32 %v202_v30, %v63_v31  ;;  %v69_v34 = vadd.f32 %v202_v30, %v68_v32  ;;  %v203_v32 = vld [vmem:[%s357_s3] ss:$0 sm:$0xff] }
  0xa3   :  { %v80_v35 = vsel %vm73_vm0, %v69_v34, 0.0  ;;  %v74_v36 = vsel %vm73_vm0, %v64_v33, 0.0 }
  0xa4   :  { %81 = vadd.xlane.f32.xlu1 %v80_v35  ;;  %75 = vadd.xlane.f32.xlu0 %v74_v36 }
  0xa8   :  { %v65_v37 = vpop.f32.mrf.mxu0  ;;  %v70_v38 = vpop.f32.mrf.mxu1 }
  0xa9   :  { %v66_v39 = vadd.f32 %v202_v30, %v65_v37  ;;  %v71_v40 = vadd.f32 %v202_v30, %v70_v38  ;;  %v204_v37 = vld [vmem:[%s358_s4] ss:$0 sm:$0xff] }
  0xab   :  { %v83_v41 = vsel %vm73_vm0, %v71_v40, 0.0  ;;  %v77_v42 = vsel %vm73_vm0, %v66_v39, 0.0 }
  0xac   :  { %84 = vadd.xlane.f32.xlu1 %v83_v41  ;;  %78 = vadd.xlane.f32.xlu0 %v77_v42 }
 0x117   :  { %v82_v50 = vpop.xlane.xlu1 %81  ;;  %v76_v51 = vpop.xlane.xlu0 %75 }
 0x118   :  { %v95_v52 = vmul.f32 %v92_v49, %v82_v50  ;;  %v93_v53 = vmul.f32 %v92_v49, %v76_v51 }
 0x11a   :  { %v313_v54 = vsub.f32 %v69_v34, %v95_v52  ;;  %v97_v55 = vsub.f32 %v64_v33, %v93_v53 }
 0x11c   :  { %v103_v56 = vmul.f32 %v313_v54, %v313_v54  ;;  %v101_v57 = vmul.f32 %v97_v55, %v97_v55 }
 0x11e   :  { %v111_v58 = vsel %vm73_vm0, %v103_v56, 0.0  ;;  %v105_v59 = vsel %vm73_vm0, %v101_v57, 0.0 }
 0x11f   :  { %v85_v60 = vpop.xlane.xlu1 %84  ;;  %112 = vadd.xlane.f32.xlu0 %v111_v58  ;;  %106 = vadd.xlane.f32.xlu2 %v105_v59  ;;  %v79_v61 = vpop.xlane.xlu0 %78 }
 0x120   :  { %v96_v62 = vmul.f32 %v92_v49, %v85_v60  ;;  %v94_v63 = vmul.f32 %v92_v49, %v79_v61 }
 0x122   :  { %v319_v0 = vsub.f32 %v71_v40, %v96_v62  ;;  %v321_v1 = vsub.f32 %v66_v39, %v94_v63 }
 0x124   :  { %v104_v2 = vmul.f32 %v319_v0, %v319_v0  ;;  %v102_v3 = vmul.f32 %v321_v1, %v321_v1 }
 0x126   :  { %v114_v4 = vsel %vm73_vm0, %v104_v2, 0.0  ;;  %v108_v5 = vsel %vm73_vm0, %v102_v3, 0.0 }
 0x127   :  { %115 = vadd.xlane.f32.xlu1 %v114_v4  ;;  %109 = vadd.xlane.f32.xlu2 %v108_v5 }
 0x192   :  { %v107_v6 = vpop.xlane.xlu2 %106  ;;  %v113_v7 = vpop.xlane.xlu0 %112 }
 0x193   :  { %v117_v8 = vmul.f32 %v107_v6, %v92_v49  ;;  %v119_v9 = vmul.f32 %v113_v7, %v92_v49 }
 0x195   :  { %v121_v10 = vadd.f32 1e-05, %v117_v8  ;;  %v123_v11 = vadd.f32 1e-05, %v119_v9 }
 0x197   :  { %207 = vrsqrt.f32 %v121_v10  ;;  %vm131_vm4 = vweird.f32 %v121_v10  ;;  %vm151_vm6 = vweird.f32 %v123_v11 }
 0x198   :  { %209 = vrsqrt.f32 %v123_v11 }
 0x19a   :  { %v116_v12 = vpop.xlane.xlu1 %115  ;;  %v110_v13 = vpop.xlane.xlu2 %109 }
 0x19b   :  { %v120_v14 = vmul.f32 %v116_v12, %v92_v49  ;;  %v118_v15 = vmul.f32 %v110_v13, %v92_v49 }
 0x19d   :  { %v208_v16 = vpop.eup %207  ;;  %v124_v17 = vadd.f32 1e-05, %v120_v14  ;;  %v122_v18 = vadd.f32 1e-05, %v118_v15 }
 0x19e   :  { %v210_v19 = vpop.eup %209  ;;  %v126_v20 = vmul.f32 %v208_v16, %v121_v10  ;;  %vm132_vm2 = vweird.f32 %v208_v16 }
 0x19f   :  { %v146_v21 = vmul.f32 %v210_v19, %v123_v11  ;;  %211 = vrsqrt.f32 %v124_v17  ;;  %vm152_vm3 = vweird.f32 %v210_v19  ;;  %vm133_vm5 = vmor %vm131_vm4, %vm132_vm2  ;;  %vm161_vm10 = vweird.f32 %v124_v17 }
 0x1a0   :  { %v127_v22 = vmul.f32 %v208_v16, %v126_v20  ;;  %213 = vrsqrt.f32 %v122_v18  ;;  %vm153_vm7 = vmor %vm151_vm6, %vm152_vm3  ;;  %vm141_vm12 = vweird.f32 %v122_v18 }
 0x1a1   :  { %v147_v23 = vmul.f32 %v210_v19, %v146_v21 }
 0x1a2   :  { %v128_v24 = vmul.f32 0.5, %v127_v22 }
 0x1a3   :  { %v148_v25 = vmul.f32 0.5, %v147_v23 }
 0x1a4   :  { %v129_v26 = vsub.f32 1.5, %v128_v24 }
 0x1a5   :  { %v212_v27 = vpop.eup %211  ;;  %v149_v28 = vsub.f32 1.5, %v148_v25 }
 0x1a6   :  { %v214_v29 = vpop.eup %213  ;;  %v130_v30 = vmul.f32 %v208_v16, %v129_v26  ;;  %v156_v31 = vmul.f32 %v212_v27, %v124_v17  ;;  %vm162_vm8 = vweird.f32 %v212_v27 }
 0x1a7   :  { %v150_v33 = vmul.f32 %v210_v19, %v149_v28  ;;  %v136_v34 = vmul.f32 %v214_v29, %v122_v18  ;;  %vm142_vm9 = vweird.f32 %v214_v29  ;;  %vm163_vm11 = vmor %vm161_vm10, %vm162_vm8 }
 0x1a8   :  { %v134_v35 = vsel %vm133_vm5, %v208_v16, %v130_v30  ;;  %v157_v36 = vmul.f32 %v212_v27, %v156_v31  ;;  %vm143_vm13 = vmor %vm141_vm12, %vm142_vm9 }
 0x1a9   :  { %v165_v38 = vmul.f32 %v134_v35, %v97_v55  ;;  %v154_v39 = vsel %vm153_vm7, %v210_v19, %v150_v33  ;;  %v137_v40 = vmul.f32 %v214_v29, %v136_v34 }
 0x1aa   :  { %v167_v41 = vmul.f32 %v154_v39, %v313_v54  ;;  %v158_v42 = vmul.f32 0.5, %v157_v36 }
 0x1ab   :  { %v173_v43 = vmul.f32 %v203_v32, %v165_v38  ;;  %v138_v44 = vmul.f32 0.5, %v137_v40 }
 0x1ac   :  { %v175_v45 = vmul.f32 %v203_v32, %v167_v41  ;;  %v159_v46 = vsub.f32 1.5, %v158_v42 }
 0x1ad   :  { %v181_v47 = vadd.f32 %v204_v37, %v173_v43  ;;  %v139_v48 = vsub.f32 1.5, %v138_v44 }
 0x1ae   :  { %v183_v49 = vadd.f32 %v204_v37, %v175_v45  ;;  %v160_v50 = vmul.f32 %v212_v27, %v159_v46 }
 0x1af   :  { %185 = vst.msk [vmem:[%s359_s5] sm:$0xff] %vm73_vm0, %v181_v47  ;;  %v140_v51 = vmul.f32 %v214_v29, %v139_v48 }
 0x1b0   :  { %187 = vst.msk [vmem:[%s359_s5 + $0x10] sm:$0xff] %vm73_vm0, %v183_v49  ;;  %v164_v52 = vsel %vm163_vm11, %v212_v27, %v160_v50 }
 0x1b1   :  { %v168_v53 = vmul.f32 %v164_v52, %v319_v0  ;;  %v144_v54 = vsel %vm143_vm13, %v214_v29, %v140_v51 }
 0x1b2   :  { %v166_v55 = vmul.f32 %v144_v54, %v321_v1 }
 0x1b3   :  { %v176_v56 = vmul.f32 %v203_v32, %v168_v53 }
 0x1b4   :  { %v174_v57 = vmul.f32 %v203_v32, %v166_v55 }
 0x1b5   :  { %v184_v58 = vadd.f32 %v204_v37, %v176_v56 }
 0x1b6   :  { %v182_v59 = vadd.f32 %v204_v37, %v174_v57 }
 0x1b7   :  { %188 = vst.msk [vmem:[%s359_s5 + $0x18] sm:$0xff] %vm73_vm0, %v184_v58 }
 0x1b8   :  { %186 = vst.msk [vmem:[%s359_s5 + $0x8] sm:$0xff] %vm73_vm0, %v182_v59 }

// kernel: cross_attention_forward.3
= control target key start
LH: loop header
LB: loop body
LE: loop exit
PB: predicated region body
PF: predicated region fallthrough
CT: control target
= control target key end

     0   :  { %s1906_s13 = smov 0   ;;  %s2504_s0 = inlined_call_operand.vmem [shape: f32[2,128,32], index: 0, kind: input, shape index: {}]   ;;  %s2505_s1 = inlined_call_operand.vmem [shape: f32[2,16,32], index: 1, kind: input, shape index: {}]   ;;  %s2506_s2 = inlined_call_operand.vmem [shape: f32[32,32], index: 2, kind: input, shape index: {}]   ;;  %s2507_s3 = inlined_call_operand.vmem [shape: f32[1,32], index: 3, kind: input, shape index: {}]   ;;  %s2508_s4 = inlined_call_operand.vmem [shape: f32[32,32], index: 4, kind: input, shape index: {}]   ;;  %s2509_s5 = inlined_call_operand.vmem [shape: f32[1,32], index: 5, kind: input, shape index: {}]   ;;  %s2510_s6 = inlined_call_operand.vmem [shape: f32[32,32], index: 6, kind: input, shape index: {}]   ;;  %s2511_s7 = inlined_call_operand.vmem [shape: f32[1,32], index: 7, kind: input, shape index: {}]   ;;  %s2512_s8 = inlined_call_operand.vmem [shape: f32[32,32], index: 8, kind: input, shape index: {}]   ;;  %s2513_s9 = inlined_call_operand.vmem [shape: f32[1,32], index: 9, kind: input, shape index: {}]   ;;  %s2514_s10 = inlined_call_operand.vmem [shape: f32[2,128,32], index: 10, kind: output, shape index: {}]  }
   0x1 LB: > { %s1629_s14 = sadd.s32 4294967295, %s1843_s13   ;;  %p1633_p0 = scmp.ge.s32.totalorder %s1843_s13, 1  ;;  %s1843_s13 = sphi %s1906_s13, %s20_s13  }
   0x2   : > { %p322_p1 = scmp.lt.s32.totalorder %s1843_s13, 3 }
   0x4   : > { %p323_p2 = pnand %p1633_p0, %p322_p1 }
   0x5   : > { %p365_p3 = scmp.lt.s32.totalorder (!%p323_p2), %s1629_s14, 1  ;;  %s1845_s16 = smov (!%p323_p2), 120  }
   0x6   : > { %326 = sbr.rel (%p323_p2) target bundleno = 1273 (0x4f9), region = 60  ;;  %s1846_s18 = smov (!%p323_p2), 104  }
   0x7   : > { %s1847_s19 = smov (!%p323_p2), 112   ;;  %s1848_s22 = smov (!%p323_p2), 8  }
   0x8   : > { %s1849_s23 = smov (!%p323_p2), 16   ;;  %s1850_s24 = smov (!%p323_p2), 24  }
   0xb   : > { %v401_v0 = vld [vmem:[%s2506_s2 + $0x10] sm:$0xff]  ;;  %v402_v1 = vld [vmem:[%s2506_s2 + $0x18] sm:$0xff]  ;;  %v399_v5 = vld [vmem:[%s2506_s2] sm:$0xff]  ;;  %s2516_s14 = smov (!%p365_p3, %s1629_s14), 1  ;;  %vm429_vm0 = vcmask 261120   ;;  %vm557_vm1 = vcmask 64512  }
   0xc   : > { %v406_v2 = vld [vmem:[%s2508_s4 + $0x10] sm:$0xff]  ;;  %v425_v3 = vpack.c.bf16 %v402_v1, %v401_v0  ;;  %v407_v4 = vld [vmem:[%s2508_s4 + $0x18] sm:$0xff]  ;;  %v400_v6 = vld [vmem:[%s2506_s2 + $0x8] sm:$0xff]  ;;  %s1688_s11 = sshll.u32 %s2516_s14, 7  ;;  %s1689_s12 = sshll.u32 %s2516_s14, 4  ;;  %vm602_vm2 = vcmask 130048  }
   0xd   : > { %v480_v7 = vpack.c.bf16 %v407_v4, %v406_v2  ;;  %v404_v8 = vld [vmem:[%s2508_s4] sm:$0xff]  ;;  %v405_v9 = vld [vmem:[%s2508_s4 + $0x8] sm:$0xff]  ;;  %v424_v10 = vpack.c.bf16 %v400_v6, %v399_v5  ;;  %s1947_s17 = scalar_lea.vmem %s2504_s0, %s1688_s11  ;;  %s374_s20 = scalar_lea.vmem %s2505_s1, %s1689_s12  ;;  %v411_v21 = vld [vmem:[%s2510_s6 + $0x10] sm:$0xff]  ;;  %vm972_vm3 = vcmask 130112   ;;  %vm1203_vm4 = vcmask 195712  }
   0xe   : > { %448 = vmatpush.bf16.msra.mxu0 %v425_v3  ;;  %v479_v11 = vpack.c.bf16 %v405_v9, %v404_v8  ;;  %v381_v12 = vld [vmem:[%s1947_s17] sm:$0xff]  ;;  %v382_v13 = vld [vmem:[%s1947_s17 + $0x8] sm:$0xff]  ;;  %v383_v18 = vld [vmem:[%s1947_s17 + $0x10] sm:$0xff]  ;;  %vm1434_vm5 = vcmask 261312  }
   0xf   : > { %493 = vmatpush.bf16.msra.mxu2 %v480_v7  ;;  %v397_v14 = vld [vmem:[%s374_s20] sm:$0xff]  ;;  %v419_v15 = vpack.c.bf16 %v382_v13, %v381_v12  ;;  %v398_v16 = vld [vmem:[%s374_s20 + $0x8] sm:$0xff]  ;;  %v384_v19 = vld [vmem:[%s1947_s17 + $0x18] sm:$0xff]  ;;  %s2467_s20 = scalar_lea.vmem %s2514_s10, %s1688_s11 }
  0x10   : > { %v423_v17 = vpack.c.bf16 %v398_v16, %v397_v14  ;;  %v420_v20 = vpack.c.bf16 %v384_v19, %v383_v18  ;;  %v412_v22 = vld [vmem:[%s2510_s6 + $0x18] sm:$0xff]  ;;  %v409_v23 = vld [vmem:[%s2510_s6] sm:$0xff]  ;;  %v410_v25 = vld [vmem:[%s2510_s6 + $0x8] sm:$0xff] }
  0x11   : > { %v502_v24 = vpack.c.bf16 %v412_v22, %v411_v21  ;;  %v501_v26 = vpack.c.bf16 %v410_v25, %v409_v23  ;;  %v385_v27 = vld [vmem:[%s1947_s17 + $0x20] sm:$0xff]  ;;  %v386_v28 = vld [vmem:[%s1947_s17 + $0x28] sm:$0xff]  ;;  %v387_v30 = vld [vmem:[%s1947_s17 + $0x30] sm:$0xff] }
  0x12   : > { %449 = vmatpush.bf16.msra.mxu0 %v424_v10  ;;  %v421_v29 = vpack.c.bf16 %v386_v28, %v385_v27  ;;  %v388_v31 = vld [vmem:[%s1947_s17 + $0x38] sm:$0xff]  ;;  %v1706_v34 = vld [vmem:[%s2509_s5] ss:$0 sm:$0xff] }
  0x13   : > { %494 = vmatpush.bf16.msra.mxu2 %v479_v11  ;;  %v422_v32 = vpack.c.bf16 %v388_v31, %v387_v30  ;;  %v1705_v38 = vld [vmem:[%s2507_s3] ss:$0 sm:$0xff] }
  0x14   : > { %v1707_v25 = vld [vmem:[%s2511_s7] ss:$0 sm:$0xff] }
  0x15   : > { %1640 = vmatmul.msk.bf16.vlgmr.msra.gmra.mxu0 %vm429_vm0, %v419_v15 }
  0x16   : > { %1644 = vmatmul.msk.bf16.vlgmr.msra.gmra.mxu2 %vm429_vm0, %v423_v17 }
  0x17   : > { %512 = vmatpush.bf16.msrb.mxu2 %v502_v24 }
  0x1b   : > { %513 = vmatpush.bf16.msrb.mxu2 %v501_v26 }
  0x25   : > { %1641 = vmatmul.msk.bf16.gmra.mxu0 %vm429_vm0, %v420_v20 }
  0x26   : > { %1645 = vmatmul.msk.bf16.vlgmr.msrb.gmra.mxu2 %vm429_vm0, %v423_v17 }
  0x35   : > { %1642 = vmatmul.msk.bf16.gmra.mxu0 %vm429_vm0, %v421_v29 }
  0x45   : > { %1643 = vmatmul.msk.bf16.gmra.mxu0 %vm429_vm0, %v422_v32 }
  0x92   : > { %v451_v33 = vpop.f32.mrf.mxu0 }
  0x93   : > { %v452_v42 = vadd.f32 %v1705_v38, %v451_v33 }
  0x95   : > { %v471_v49 = vmul.f32 0.35355338, %v452_v42 }
  0x97   : > { %v520_v54 = vpack.c.bf16 %v471_v49, %v471_v49 }
  0x99   : > { %v496_v35 = vpop.f32.mrf.mxu2  ;;  %v540_v61 = vunpack.c.l.b16 %v520_v54 }
  0x9a   : > { %v453_v36 = vpop.f32.mrf.mxu0  ;;  %v497_v37 = vadd.f32 %v1706_v34, %v496_v35 }
  0x9b   : > { %v454_v40 = vadd.f32 %v1705_v38, %v453_v36 }
  0x9c   : > { %v528_v39 = vpack.c.bf16 %v497_v37, %v497_v37 }
  0x9d   : > { %v472_v46 = vmul.f32 0.35355338, %v454_v40 }
  0x9e   : > { %v554_v45 = vunpack.c.l.b16 %v528_v39 }
  0x9f   : > { %v521_v51 = vpack.c.bf16 %v472_v46, %v472_v46 }
  0xa1   : > { %v498_v41 = vpop.f32.mrf.mxu2  ;;  %v541_v58 = vunpack.c.l.b16 %v521_v51 }
  0xa2   : > { %v499_v43 = vadd.f32 %v1706_v34, %v498_v41  ;;  %v456_v44 = vpop.f32.mrf.mxu0 }
  0xa3   : > { %v457_v48 = vadd.f32 %v1705_v38, %v456_v44  ;;  %v548_v63 = vpack.c.b16 %v541_v58, %v540_v61 }
  0xa4   : > { %v529_v47 = vpack.c.bf16 %v499_v43, %v499_v43 }
  0xa5   : > { %v473_v53 = vmul.f32 0.35355338, %v457_v48 }
  0xa6   : > { %v555_v50 = vunpack.c.l.b16 %v529_v47 }
  0xa7   : > { %v522_v59 = vpack.c.bf16 %v473_v53, %v473_v53 }
  0xa8   : > { %v556_v52 = vpack.c.b16 %v555_v50, %v554_v45 }
  0xa9   : > { %v542_v0 = vunpack.c.l.b16 %v522_v59  ;;  %v515_v26 = vpop.f32.mrf.mxu2 }
  0xaa   : > { %758 = vrot.lane.b32.xlu0 %v556_v52, %s1845_s16  ;;  %v458_v55 = vpop.f32.mrf.mxu0  ;;  %v571_v56 = vsel %vm557_vm1, %v556_v52, 0  ;;  %v516_v27 = vadd.f32 %v1707_v25, %v515_v26 }
  0xab   : > { %v459_v57 = vadd.f32 %v1705_v38, %v458_v55  ;;  %580 = vmatpush.bf16.xpose.msra.mxu3 %v571_v56 }
  0xac   : > { %v530_v28 = vpack.c.bf16 %v516_v27, %v516_v27 }
  0xad   : > { %v474_v60 = vmul.f32 0.35355338, %v459_v57 }
  0xae   : > { %v697_v31 = vunpack.c.l.b16 %v530_v28 }
  0xaf   : > { %v523_v62 = vpack.c.bf16 %v474_v60, %v474_v60 }
  0xb1   : > { %v543_v1 = vunpack.c.l.b16 %v523_v62  ;;  %v517_v29 = vpop.f32.mrf.mxu2 }
  0xb2   : > { %750 = vrot.lane.b32.xlu0 %v548_v63, %s1845_s16  ;;  %1646 = vmatmul.msk.bf16.vlgmr.msra.gmra.mxu3 %vm557_vm1, %v548_v63  ;;  %v461_v2 = vpop.f32.mrf.mxu0  ;;  %v518_v30 = vadd.f32 %v1707_v25, %v517_v29 }
  0xb3   : > { %v549_v3 = vpack.c.b16 %v543_v1, %v542_v0  ;;  %v462_v4 = vadd.f32 %v1705_v38, %v461_v2 }
  0xb4   : > { %v531_v32 = vpack.c.bf16 %v518_v30, %v518_v30 }
  0xb5   : > { %752 = vrot.lane.b32.xlu1 %v549_v3, %s1845_s16  ;;  %v475_v5 = vmul.f32 0.35355338, %v462_v4 }
  0xb6   : > { %v698_v33 = vunpack.c.l.b16 %v531_v32 }
  0xb7   : > { %v524_v8 = vpack.c.bf16 %v475_v5, %v475_v5 }
  0xb8   : > { %v2004_v34 = vpack.c.b16 %v698_v33, %v697_v31 }
  0xb9   : > { %v544_v11 = vunpack.c.l.b16 %v524_v8 }
  0xba   : > { %1220 = vrot.lane.b32.xlu0 %v556_v52, %s1846_s18  ;;  %v463_v6 = vpop.f32.mrf.mxu0  ;;  %720 = vmatpush.bf16.msra.mxu1 %v2004_v34 }
  0xbb   : > { %v464_v7 = vadd.f32 %v1705_v38, %v463_v6 }
  0xbd   : > { %v476_v9 = vmul.f32 0.35355338, %v464_v7 }
  0xbf   : > { %v525_v10 = vpack.c.bf16 %v476_v9, %v476_v9 }
  0xc1   : > { %v545_v12 = vunpack.c.l.b16 %v525_v10 }
  0xc2   : > { %983 = vrot.lane.b32.xlu0 %v549_v3, %s1847_s19  ;;  %1647 = vmatmul.msk.bf16.gmra.mxu3 %vm557_vm1, %v549_v3  ;;  %v466_v13 = vpop.f32.mrf.mxu0 }
  0xc3   : > { %v550_v14 = vpack.c.b16 %v545_v12, %v544_v11  ;;  %v467_v15 = vadd.f32 %v1705_v38, %v466_v13 }
  0xc5   : > { %754 = vrot.lane.b32.xlu1 %v550_v14, %s1845_s16  ;;  %v477_v16 = vmul.f32 0.35355338, %v467_v15 }
  0xc7   : > { %v526_v19 = vpack.c.bf16 %v477_v16, %v477_v16 }
  0xc9   : > { %v546_v22 = vunpack.c.l.b16 %v526_v19 }
  0xca   : > { %1216 = vrot.lane.b32.xlu0 %v550_v14, %s1846_s18  ;;  %v468_v17 = vpop.f32.mrf.mxu0 }
  0xcb   : > { %v469_v18 = vadd.f32 %v1705_v38, %v468_v17 }
  0xcd   : > { %v478_v20 = vmul.f32 0.35355338, %v469_v18  ;;  %981 = vrot.lane.b32.xlu1 %v548_v63, %s1847_s19 }
  0xcf   : > { %v527_v21 = vpack.c.bf16 %v478_v20, %v478_v20 }
  0xd1   : > { %v547_v23 = vunpack.c.l.b16 %v527_v21 }
  0xd2   : > { %1648 = vmatmul.msk.bf16.gmra.mxu3 %vm557_vm1, %v550_v14 }
  0xd3   : > { %v551_v24 = vpack.c.b16 %v547_v23, %v546_v22 }
  0xd5   : > { %756 = vrot.lane.b32.xlu2 %v551_v24, %s1845_s16  ;;  %1214 = vrot.lane.b32.xlu1 %v549_v3, %s1846_s18 }
  0xdd   : > { %989 = vrot.lane.b32.xlu2 %v556_v52, %s1847_s19  ;;  %987 = vrot.lane.b32.xlu1 %v551_v24, %s1847_s19 }
  0xe2   : > { %1649 = vmatmul.msk.bf16.gmra.mxu3 %vm557_vm1, %v551_v24 }
  0xe5   : > { %1212 = vrot.lane.b32.xlu2 %v548_v63, %s1846_s18  ;;  %896 = vrot.lane.b32.xlu1 %v2004_v34, %s1845_s16 }
  0xed   : > { %985 = vrot.lane.b32.xlu2 %v550_v14, %s1847_s19 }
  0xf5   : > { %1218 = vrot.lane.b32.xlu2 %v551_v24, %s1846_s18 }
 0x11c   : > { %v759_v35 = vpop.permute.xlu0 %758 }
 0x11d   : > { %v773_v36 = vsel %vm557_vm1, %v759_v35, 0 }
 0x11e   : > { %782 = vmatpush.bf16.xpose.msra.mxu2 %v773_v36 }
 0x124   : > { %v751_v37 = vpop.permute.xlu0 %750 }
 0x125   : > { %1654 = vmatmul.msk.bf16.vlgmr.msra.gmra.mxu2 %vm557_vm1, %v751_v37 }
 0x127   : > { %v753_v40 = vpop.permute.xlu1 %752 }
 0x12c   : > { %v1221_v38 = vpop.permute.xlu0 %1220 }
 0x12d   : > { %v1235_v39 = vsel %vm557_vm1, %v1221_v38, 0 }
 0x12e   : > { %1244 = vmatpush.bf16.xpose.msrb.mxu2 %v1235_v39 }
 0x12f   : > { %v757_v41 = vpop.permute.xlu2 %756 }
 0x134   : > { %v984_v54 = vpop.permute.xlu0 %983 }
 0x135   : > { %v2015_v42 = vpop.f32.mrf.mxu3  ;;  %1655 = vmatmul.msk.bf16.gmra.mxu2 %vm557_vm1, %v753_v40 }
 0x136   : > { %v603_v43 = vsel %vm602_vm2, %v2015_v42, -inf }
 0x137   : > { %604 = vmax.xlane.f32.xlu0 %v603_v43  ;;  %v990_v44 = vpop.permute.xlu2 %989  ;;  %v755_v45 = vpop.permute.xlu1 %754 }
 0x138   : > { %v1004_v46 = vsel %vm557_vm1, %v990_v44, 0 }
 0x139   : > { %1013 = vmatpush.bf16.xpose.msrb.mxu3 %v1004_v46 }
 0x13c   : > { %v1217_v3 = vpop.permute.xlu0 %1216 }
 0x13d   : > { %v584_v47 = vpop.f32.mrf.mxu3 }
 0x13e   : > { %v606_v48 = vsel %vm602_vm2, %v584_v47, -inf }
 0x13f   : > { %607 = vmax.xlane.f32.xlu1 %v606_v48  ;;  %v982_v49 = vpop.permute.xlu1 %981  ;;  %v1213_v55 = vpop.permute.xlu2 %1212 }
 0x140   : > { %1662 = vmatmul.msk.bf16.vlgmr.msrb.gmra.mxu3 %vm557_vm1, %v982_v49 }
 0x145   : > { %v2023_v50 = vpop.f32.mrf.mxu3  ;;  %1656 = vmatmul.msk.bf16.gmra.mxu2 %vm557_vm1, %v755_v45 }
 0x146   : > { %v609_v51 = vsel %vm602_vm2, %v2023_v50, -inf }
 0x147   : > { %610 = vmax.xlane.f32.xlu0 %v609_v51  ;;  %v986_v60 = vpop.permute.xlu2 %985  ;;  %v1215_v61 = vpop.permute.xlu1 %1214 }
 0x14d   : > { %v2028_v52 = vpop.f32.mrf.mxu3 }
 0x14e   : > { %v612_v53 = vsel %vm602_vm2, %v2028_v52, -inf }
 0x14f   : > { %613 = vmax.xlane.f32.xlu1 %v612_v53  ;;  %v988_v2 = vpop.permute.xlu1 %987  ;;  %v1219_v5 = vpop.permute.xlu2 %1218 }
 0x150   : > { %1663 = vmatmul.msk.bf16.gmra.mxu3 %vm557_vm1, %v984_v54 }
 0x155   : > { %v2033_v56 = vpop.f32.mrf.mxu3  ;;  %1657 = vmatmul.msk.bf16.gmra.mxu2 %vm557_vm1, %v757_v41 }
 0x156   : > { %v615_v57 = vsel %vm602_vm2, %v2033_v56, -inf }
 0x157   : > { %616 = vmax.xlane.f32.xlu1 %v615_v57  ;;  %v897_v4 = vpop.permute.xlu1 %896 }
 0x158   : > { %918 = vmatpush.bf16.msrb.mxu0 %v897_v4 }
 0x15d   : > { %v2038_v58 = vpop.f32.mrf.mxu3 }
 0x15e   : > { %v618_v59 = vsel %vm602_vm2, %v2038_v58, -inf }
 0x15f   : > { %619 = vmax.xlane.f32.xlu2 %v618_v59 }
 0x160   : > { %1664 = vmatmul.msk.bf16.gmra.mxu3 %vm557_vm1, %v986_v60 }
 0x165   : > { %v2043_v62 = vpop.f32.mrf.mxu3  ;;  %1670 = vmatmul.msk.bf16.vlgmr.msrb.gmra.mxu2 %vm557_vm1, %v1213_v55 }
 0x166   : > { %v621_v63 = vsel %vm602_vm2, %v2043_v62, -inf }
 0x167   : > { %622 = vmax.xlane.f32.xlu2 %v621_v63 }
 0x16d   : > { %v2048_v0 = vpop.f32.mrf.mxu3 }
 0x16e   : > { %v624_v1 = vsel %vm602_vm2, %v2048_v0, -inf }
 0x16f   : > { %625 = vmax.xlane.f32.xlu0 %v624_v1 }
 0x170   : > { %1665 = vmatmul.msk.bf16.gmra.mxu3 %vm557_vm1, %v988_v2 }
 0x175   : > { %1671 = vmatmul.msk.bf16.gmra.mxu2 %vm557_vm1, %v1215_v61 }
 0x185   : > { %1672 = vmatmul.msk.bf16.gmra.mxu2 %vm557_vm1, %v1217_v3 }
 0x195   : > { %1673 = vmatmul.msk.bf16.gmra.mxu2 %vm557_vm1, %v1219_v5 }
 0x1a8   : > { %v2056_v6 = vpop.f32.mrf.mxu2 }
 0x1a9   : > { %v804_v7 = vsel %vm602_vm2, %v2056_v6, -inf }
 0x1aa   : > { %805 = vmax.xlane.f32.xlu2 %v804_v7  ;;  %v605_v15 = vpop.xlane.xlu0 %604 }
 0x1ab   : > { %v627_v17 = vsub.f32 %v2015_v42, %v605_v15 }
 0x1ad   : > { %v635_v20 = vmul.f32 1.442695, %v627_v17 }
 0x1b0   : > { %v2060_v8 = vpop.f32.mrf.mxu2 }
 0x1b1   : > { %v807_v23 = vsel %vm602_vm2, %v2060_v8, -inf }
 0x1b2   : > { %v608_v9 = vpop.xlane.xlu1 %607 }
 0x1b3   : > { %v628_v10 = vsub.f32 %v584_v47, %v608_v9 }
 0x1b5   : > { %v637_v11 = vmul.f32 1.442695, %v628_v10 }
 0x1b7   : > { %1709 = vpow2.f32 %v637_v11 }
 0x1b8   : > { %v2062_v12 = vpop.f32.mrf.mxu2  ;;  %1711 = vpow2.f32 %v635_v20 }
 0x1b9   : > { %v810_v31 = vsel %vm602_vm2, %v2062_v12, -inf }
 0x1ba   : > { %v611_v25 = vpop.xlane.xlu0 %610 }
 0x1bb   : > { %v629_v29 = vsub.f32 %v2023_v50, %v611_v25 }
 0x1bd   : > { %v2064_v13 = vpop.eup %1709  ;;  %v639_v33 = vmul.f32 1.442695, %v629_v29 }
 0x1be   : > { %v654_v14 = vsel %vm602_vm2, %v2064_v13, 0.0  ;;  %v2085_v27 = vpop.eup %1711 }
 0x1bf   : > { %655 = vadd.xlane.f32.xlu1 %v654_v14  ;;  %v651_v32 = vsel %vm602_vm2, %v2085_v27, 0.0  ;;  %1713 = vpow2.f32 %v639_v33 }
 0x1c0   : > { %v2068_v16 = vpop.f32.mrf.mxu2 }
 0x1c1   : > { %v813_v44 = vsel %vm602_vm2, %v2068_v16, -inf }
 0x1c2   : > { %v614_v45 = vpop.xlane.xlu1 %613 }
 0x1c3   : > { %v2071_v18 = vpop.f32.mrf.mxu3  ;;  %v630_v51 = vsub.f32 %v2028_v52, %v614_v45 }
 0x1c4   : > { %v1035_v19 = vsel %vm602_vm2, %v2071_v18, -inf }
 0x1c5   : > { %1036 = vmax.xlane.f32.xlu2 %v1035_v19  ;;  %v2106_v41 = vpop.eup %1713  ;;  %v641_v59 = vmul.f32 1.442695, %v630_v51 }
 0x1c6   : > { %v657_v43 = vsel %vm602_vm2, %v2106_v41, 0.0 }
 0x1c8   : > { %v2075_v21 = vpop.f32.mrf.mxu2 }
 0x1c9   : > { %v816_v54 = vsel %vm602_vm2, %v2075_v21, -inf }
 0x1cb   : > { %v2077_v22 = vpop.f32.mrf.mxu3 }
 0x1cc   : > { %v1038_v24 = vsel %vm602_vm2, %v2077_v22, -inf }
 0x1cd   : > { %808 = vmax.xlane.f32.xlu2 %v807_v23  ;;  %1039 = vmax.xlane.f32.xlu0 %v1038_v24 }
 0x1d0   : > { %v2083_v26 = vpop.f32.mrf.mxu2 }
 0x1d1   : > { %v819_v28 = vsel %vm602_vm2, %v2083_v26, -inf }
 0x1d2   : > { %820 = vmax.xlane.f32.xlu1 %v819_v28  ;;  %v620_v39 = vpop.xlane.xlu2 %619 }
 0x1d3   : > { %v2090_v30 = vpop.f32.mrf.mxu3  ;;  %v632_v48 = vsub.f32 %v2038_v58, %v620_v39  ;;  %v617_v58 = vpop.xlane.xlu1 %616 }
 0x1d4   : > { %v1041_v38 = vsel %vm602_vm2, %v2090_v30, -inf  ;;  %v631_v52 = vsub.f32 %v2033_v56, %v617_v58 }
 0x1d5   : > { %811 = vmax.xlane.f32.xlu2 %v810_v31  ;;  %652 = vadd.xlane.f32.xlu0 %v651_v32  ;;  %v645_v55 = vmul.f32 1.442695, %v632_v48 }
 0x1d6   : > { %v643_v3 = vmul.f32 1.442695, %v631_v52 }
 0x1d7   : > { %1715 = vpow2.f32 %v645_v55 }
 0x1d8   : > { %v2096_v35 = vpop.f32.mrf.mxu2 }
 0x1da   : > { %v623_v46 = vpop.xlane.xlu2 %622 }
 0x1db   : > { %v2098_v36 = vpop.f32.mrf.mxu3  ;;  %v633_v49 = vsub.f32 %v2043_v62, %v623_v46  ;;  %v822_v62 = vsel %vm602_vm2, %v2096_v35, -inf }
 0x1dc   : > { %v1044_v37 = vsel %vm602_vm2, %v2098_v36, -inf }
 0x1dd   : > { %1045 = vmax.xlane.f32.xlu2 %v1044_v37  ;;  %1042 = vmax.xlane.f32.xlu0 %v1041_v38  ;;  %v647_v57 = vmul.f32 1.442695, %v633_v49  ;;  %v2136_v2 = vpop.eup %1715 }
 0x1de   : > { %v666_v9 = vsel %vm602_vm2, %v2136_v2, 0.0 }
 0x1df   : > { %1717 = vpow2.f32 %v647_v57 }
 0x1e0   : > { %v2104_v40 = vpop.f32.mrf.mxu2  ;;  %1719 = vpow2.f32 %v641_v59 }
 0x1e1   : > { %1721 = vpow2.f32 %v643_v3  ;;  %v825_v19 = vsel %vm602_vm2, %v2104_v40, -inf }
 0x1e2   : > { %v626_v11 = vpop.xlane.xlu0 %625 }
 0x1e3   : > { %v2108_v42 = vpop.f32.mrf.mxu3  ;;  %v634_v17 = vsub.f32 %v2048_v0, %v626_v11 }
 0x1e4   : > { %v1047_v1 = vsel %vm602_vm2, %v2108_v42, -inf }
 0x1e5   : > { %658 = vadd.xlane.f32.xlu2 %v657_v43  ;;  %814 = vmax.xlane.f32.xlu0 %v813_v44  ;;  %v2140_v5 = vpop.eup %1717  ;;  %v649_v23 = vmul.f32 1.442695, %v634_v17 }
 0x1e6   : > { %v2142_v56 = vpop.eup %1719  ;;  %v669_v7 = vsel %vm602_vm2, %v2140_v5, 0.0 }
 0x1e7   : > { %v660_v10 = vsel %vm602_vm2, %v2142_v56, 0.0  ;;  %v2152_v15 = vpop.eup %1721  ;;  %1723 = vpow2.f32 %v649_v23 }
 0x1e8   : > { %v2114_v47 = vpop.f32.mrf.mxu2  ;;  %v663_v20 = vsel %vm602_vm2, %v2152_v15, 0.0 }
 0x1e9   : > { %v1266_v25 = vsel %vm602_vm2, %v2114_v47, -inf }
 0x1eb   : > { %v2118_v50 = vpop.f32.mrf.mxu3 }
 0x1ec   : > { %v1050_v53 = vsel %vm602_vm2, %v2118_v50, -inf }
 0x1ed   : > { %1051 = vmax.xlane.f32.xlu1 %v1050_v53  ;;  %817 = vmax.xlane.f32.xlu0 %v816_v54  ;;  %v2167_v29 = vpop.eup %1723 }
 0x1ee   : > { %v672_v31 = vsel %vm602_vm2, %v2167_v29, 0.0 }
 0x1f0   : > { %v2125_v60 = vpop.f32.mrf.mxu2 }
 0x1f1   : > { %v1269_v28 = vsel %vm602_vm2, %v2125_v60, -inf }
 0x1f3   : > { %v2127_v61 = vpop.f32.mrf.mxu3 }
 0x1f4   : > { %v1053_v63 = vsel %vm602_vm2, %v2127_v61, -inf }
 0x1f5   : > { %823 = vmax.xlane.f32.xlu1 %v822_v62  ;;  %1054 = vmax.xlane.f32.xlu2 %v1053_v63 }
 0x1f6   : > { %1048 = vmax.xlane.f32.xlu0 %v1047_v1 }
 0x1f8   : > { %v2138_v4 = vpop.f32.mrf.mxu2 }
 0x1f9   : > { %v1272_v32 = vsel %vm602_vm2, %v2138_v4, -inf }
 0x1fd   : > { %670 = vadd.xlane.f32.xlu1 %v669_v7  ;;  %667 = vadd.xlane.f32.xlu2 %v666_v9 }
 0x1fe   : > { %661 = vadd.xlane.f32.xlu0 %v660_v10 }
 0x200   : > { %v2150_v14 = vpop.f32.mrf.mxu2 }
 0x201   : > { %v1275_v38 = vsel %vm602_vm2, %v2150_v14, -inf }
 0x205   : > { %826 = vmax.xlane.f32.xlu2 %v825_v19 }
 0x206   : > { %664 = vadd.xlane.f32.xlu0 %v663_v20 }
 0x208   : > { %v2159_v24 = vpop.f32.mrf.mxu2 }
 0x209   : > { %v1278_v46 = vsel %vm602_vm2, %v2159_v24, -inf }
 0x20d   : > { %1267 = vmax.xlane.f32.xlu2 %v1266_v25  ;;  %v2206_v25 = vpop.f32.mrf.mxu3 }
 0x20e   : > { %1270 = vmax.xlane.f32.xlu0 %v1269_v28 }
 0x210   : > { %v2165_v0 = vpop.f32.mrf.mxu2 }
 0x211   : > { %v1281_v43 = vsel %vm602_vm2, %v2165_v0, -inf }
 0x215   : > { %673 = vadd.xlane.f32.xlu2 %v672_v31 }
 0x216   : > { %1273 = vmax.xlane.f32.xlu0 %v1272_v32  ;;  %v1056_v32 = vsel %vm602_vm2, %v2206_v25, -inf }
 0x218   : > { %v2173_v33 = vpop.f32.mrf.mxu2 }
 0x219   : > { %v1284_v37 = vsel %vm602_vm2, %v2173_v33, -inf }
 0x21a   : > { %1285 = vmax.xlane.f32.xlu1 %v1284_v37 }
 0x21d   : > { %v806_v39 = vpop.xlane.xlu2 %805  ;;  %1276 = vmax.xlane.f32.xlu2 %v1275_v38 }
 0x21e   : > { %v828_v44 = vsub.f32 %v2056_v6, %v806_v39  ;;  %1282 = vmax.xlane.f32.xlu0 %v1281_v43 }
 0x220   : > { %v836_v45 = vmul.f32 1.442695, %v828_v44  ;;  %v2188_v51 = vpop.f32.mrf.mxu2 }
 0x221   : > { %v1287_v53 = vsel %vm602_vm2, %v2188_v51, -inf }
 0x222   : > { %1725 = vpow2.f32 %v836_v45 }
 0x225   : > { %1279 = vmax.xlane.f32.xlu2 %v1278_v46 }
 0x228   : > { %v2184_v48 = vpop.eup %1725 }
 0x229   : > { %v852_v49 = vsel %vm602_vm2, %v2184_v48, 0.0 }
 0x22d   : > { %853 = vadd.xlane.f32.xlu2 %v852_v49 }
 0x232   : > { %v656_v62 = vpop.xlane.xlu1 %655 }
 0x235   : > { %1288 = vmax.xlane.f32.xlu2 %v1287_v53 }
 0x238   : > { %v1037_v6 = vpop.xlane.xlu2 %1036 }
 0x239   : > { %v1059_v9 = vsub.f32 %v2071_v18, %v1037_v6 }
 0x240   : > { %v809_v54 = vpop.xlane.xlu2 %808  ;;  %v1040_v55 = vpop.xlane.xlu0 %1039 }
 0x241   : > { %v829_v57 = vsub.f32 %v2060_v8, %v809_v54  ;;  %v1060_v59 = vsub.f32 %v2077_v22, %v1040_v55 }
 0x243   : > { %v838_v58 = vmul.f32 1.442695, %v829_v57  ;;  %v1069_v52 = vmul.f32 1.442695, %v1060_v59 }
 0x245   : > { %1727 = vpow2.f32 %v838_v58 }
 0x246   : > { %1729 = vpow2.f32 %v1069_v52 }
 0x247   : > { %1731 = vrcp.f32 %v656_v62 }
 0x248   : > { %v812_v63 = vpop.xlane.xlu2 %811  ;;  %v653_v1 = vpop.xlane.xlu0 %652 }
 0x249   : > { %v830_v3 = vsub.f32 %v2062_v12, %v812_v63  ;;  %1733 = vrcp.f32 %v653_v1  ;;  %v1067_v12 = vmul.f32 1.442695, %v1059_v9 }
 0x24b   : > { %v2195_v7 = vpop.eup %1727  ;;  %v840_v10 = vmul.f32 1.442695, %v830_v3 }
 0x24c   : > { %v2198_v11 = vpop.eup %1729  ;;  %v855_v8 = vsel %vm602_vm2, %v2195_v7, 0.0 }
 0x24d   : > { %v1732_v22 = vpop.eup %1731  ;;  %1735 = vpow2.f32 %v840_v10  ;;  %856 = vadd.xlane.f32.xlu0 %v855_v8  ;;  %v1086_v17 = vsel %vm602_vm2, %v2198_v11, 0.0 }
 0x24e   : > { %1087 = vadd.xlane.f32.xlu1 %v1086_v17  ;;  %v684_v18 = vmul.f32 %v1732_v22, %v2064_v13  ;;  %1737 = vpow2.f32 %v1067_v12 }
 0x24f   : > { %v1734_v19 = vpop.eup %1733 }
 0x250   : > { %v1043_v20 = vpop.xlane.xlu0 %1042  ;;  %v683_v23 = vmul.f32 %v1734_v19, %v2085_v27  ;;  %v1046_v38 = vpop.xlane.xlu2 %1045 }
 0x251   : > { %v821_v27 = vpop.xlane.xlu1 %820  ;;  %v1061_v3 = vsub.f32 %v2090_v30, %v1043_v20  ;;  %v1062_v19 = vsub.f32 %v2098_v36, %v1046_v38 }
 0x252   : > { %v691_v28 = vpack.c.bf16 %v684_v18, %v683_v23  ;;  %v833_v44 = vsub.f32 %v2083_v26, %v821_v27 }
 0x253   : > { %v2208_v31 = vpop.eup %1735  ;;  %v1071_v8 = vmul.f32 1.442695, %v1061_v3  ;;  %v1073_v20 = vmul.f32 1.442695, %v1062_v19 }
 0x254   : > { %1650 = vmatmul.msk.bf16.vlgmr.msra.gmra.mxu1 %vm602_vm2, %v691_v28  ;;  %v858_v37 = vsel %vm602_vm2, %v2208_v31, 0.0  ;;  %v2215_v13 = vpop.eup %1737  ;;  %v846_v49 = vmul.f32 1.442695, %v833_v44 }
 0x255   : > { %1057 = vmax.xlane.f32.xlu0 %v1056_v32  ;;  %v1083_v46 = vsel %vm602_vm2, %v2215_v13, 0.0 }
 0x256   : > { %859 = vadd.xlane.f32.xlu1 %v858_v37 }
 0x258   : > { %v815_v39 = vpop.xlane.xlu0 %814  ;;  %v659_v53 = vpop.xlane.xlu2 %658 }
 0x259   : > { %v831_v43 = vsub.f32 %v2068_v16, %v815_v39 }
 0x25b   : > { %v842_v45 = vmul.f32 1.442695, %v831_v43 }
 0x25d   : > { %1739 = vpow2.f32 %v842_v45  ;;  %1084 = vadd.xlane.f32.xlu0 %v1083_v46 }
 0x25e   : > { %1741 = vpow2.f32 %v846_v49 }
 0x260   : > { %v2221_v6 = vpop.xlane.xlu1 %1051  ;;  %v818_v54 = vpop.xlane.xlu0 %817 }
 0x261   : > { %v832_v55 = vsub.f32 %v2075_v21, %v818_v54 }
 0x263   : > { %v2224_v57 = vpop.eup %1739  ;;  %v844_v59 = vmul.f32 1.442695, %v832_v55 }
 0x264   : > { %v861_v16 = vsel %vm602_vm2, %v2224_v57, 0.0  ;;  %v2230_v52 = vpop.eup %1741 }
 0x265   : > { %862 = vadd.xlane.f32.xlu2 %v861_v16  ;;  %1743 = vpow2.f32 %v844_v59  ;;  %v867_v9 = vsel %vm602_vm2, %v2230_v52, 0.0 }
 0x268   : > { %v824_v26 = vpop.xlane.xlu1 %823  ;;  %v2228_v58 = vpop.xlane.xlu2 %1054 }
 0x269   : > { %v834_v62 = vsub.f32 %v2096_v35, %v824_v26  ;;  %v2233_v63 = vpop.xlane.xlu0 %1048 }
 0x26b   : > { %v848_v1 = vmul.f32 1.442695, %v834_v62  ;;  %v2235_v21 = vpop.eup %1743 }
 0x26c   : > { %v864_v10 = vsel %vm602_vm2, %v2235_v21, 0.0 }
 0x26d   : > { %1745 = vpow2.f32 %v848_v1  ;;  %868 = vadd.xlane.f32.xlu2 %v867_v9  ;;  %865 = vadd.xlane.f32.xlu0 %v864_v10  ;;  %v1064_v10 = vsub.f32 %v2118_v50, %v2221_v6  ;;  %v1065_v50 = vsub.f32 %v2127_v61, %v2228_v58 }
 0x26e   : > { %1747 = vrcp.f32 %v659_v53 }
 0x270   : > { %v668_v22 = vpop.xlane.xlu2 %667  ;;  %v671_v19 = vpop.xlane.xlu1 %670 }
 0x271   : > { %v662_v35 = vpop.xlane.xlu0 %661 }
 0x272   : > { %1749 = vrcp.f32 %v662_v35 }
 0x273   : > { %v2242_v17 = vpop.eup %1745  ;;  %1751 = vpow2.f32 %v1071_v8 }
 0x274   : > { %v870_v30 = vsel %vm602_vm2, %v2242_v17, 0.0  ;;  %v1748_v12 = vpop.eup %1747  ;;  %1753 = vpow2.f32 %v1073_v20 }
 0x275   : > { %871 = vadd.xlane.f32.xlu0 %v870_v30  ;;  %v685_v27 = vmul.f32 %v1748_v12, %v2106_v41 }
 0x278   : > { %v827_v23 = vpop.xlane.xlu2 %826  ;;  %v1750_v18 = vpop.eup %1749 }
 0x279   : > { %v835_v28 = vsub.f32 %v2104_v40, %v827_v23  ;;  %v665_v32 = vpop.xlane.xlu0 %664  ;;  %v2248_v37 = vpop.eup %1751  ;;  %v686_v39 = vmul.f32 %v1750_v18, %v2142_v56  ;;  %v1079_v23 = vmul.f32 1.442695, %v1065_v50 }
 0x27a   : > { %v1089_v38 = vsel %vm602_vm2, %v2248_v37, 0.0  ;;  %v2256_v46 = vpop.eup %1753 }
 0x27b   : > { %v850_v43 = vmul.f32 1.442695, %v835_v28  ;;  %v692_v36 = vpack.c.bf16 %v686_v39, %v685_v27  ;;  %v1092_v59 = vsel %vm602_vm2, %v2256_v46, 0.0 }
 0x27d   : > { %1755 = vpow2.f32 %v850_v43  ;;  %1651 = vmatmul.msk.bf16.gmra.mxu1 %vm602_vm2, %v692_v36  ;;  %1090 = vadd.xlane.f32.xlu0 %v1089_v38 }
 0x27e   : > { %1757 = vrcp.f32 %v665_v32 }
 0x27f   : > { %1759 = vrcp.f32 %v668_v22 }
 0x280   : > { %v1268_v44 = vpop.xlane.xlu2 %1267 }
 0x281   : > { %v1290_v40 = vsub.f32 %v2114_v47, %v1268_v44  ;;  %v1271_v45 = vpop.xlane.xlu0 %1270 }
 0x282   : > { %v1291_v41 = vsub.f32 %v2125_v60, %v1271_v45 }
 0x283   : > { %v2259_v56 = vpop.eup %1755  ;;  %v1298_v49 = vmul.f32 1.442695, %v1290_v40 }
 0x284   : > { %v1300_v53 = vmul.f32 1.442695, %v1291_v41  ;;  %v873_v54 = vsel %vm602_vm2, %v2259_v56, 0.0  ;;  %v1758_v55 = vpop.eup %1757 }
 0x285   : > { %1761 = vpow2.f32 %v1298_v49  ;;  %874 = vadd.xlane.f32.xlu1 %v873_v54  ;;  %1093 = vadd.xlane.f32.xlu0 %v1092_v59  ;;  %v1760_v47 = vpop.eup %1759  ;;  %v687_v26 = vmul.f32 %v1758_v55, %v2152_v15  ;;  %v1063_v49 = vsub.f32 %v2108_v42, %v2233_v63 }
 0x286   : > { %1763 = vpow2.f32 %v1300_v53  ;;  %v688_v1 = vmul.f32 %v1760_v47, %v2136_v2  ;;  %v1077_v2 = vmul.f32 1.442695, %v1064_v10 }
 0x287   : > { %v1075_v59 = vmul.f32 1.442695, %v1063_v49 }
 0x288   : > { %v674_v16 = vpop.xlane.xlu2 %673  ;;  %v693_v22 = vpack.c.bf16 %v688_v1, %v687_v26 }
 0x289   : > { %v1274_v60 = vpop.xlane.xlu0 %1273 }
 0x28a   : > { %v1292_v62 = vsub.f32 %v2138_v4, %v1274_v60 }
 0x28b   : > { %v2268_v3 = vpop.eup %1761 }
 0x28c   : > { %v2270_v9 = vpop.eup %1763  ;;  %v1302_v8 = vmul.f32 1.442695, %v1292_v62  ;;  %v1314_v35 = vsel %vm602_vm2, %v2268_v3, 0.0 }
 0x28d   : > { %1315 = vadd.xlane.f32.xlu2 %v1314_v35  ;;  %v1317_v15 = vsel %vm602_vm2, %v2270_v9, 0.0  ;;  %1652 = vmatmul.msk.bf16.gmra.mxu1 %vm602_vm2, %v693_v22  ;;  %v1286_v53 = vpop.xlane.xlu1 %1285 }
 0x28e   : > { %1765 = vpow2.f32 %v1302_v8  ;;  %1318 = vadd.xlane.f32.xlu0 %v1317_v15  ;;  %v1296_v55 = vsub.f32 %v2173_v33, %v1286_v53 }
 0x28f   : > { %1767 = vrcp.f32 %v674_v16 }
 0x290   : > { %v1277_v4 = vpop.xlane.xlu2 %1276  ;;  %1769 = vrcp.f32 %v671_v19  ;;  %v1310_v16 = vmul.f32 1.442695, %v1296_v55 }
 0x291   : > { %1771 = vpow2.f32 %v1077_v2  ;;  %v1293_v41 = vsub.f32 %v2150_v14, %v1277_v4 }
 0x292   : > { %1773 = vpow2.f32 %v1079_v23 }
 0x294   : > { %v2279_v30 = vpop.eup %1765 }
 0x295   : > { %v1768_v6 = vpop.eup %1767  ;;  %v1320_v12 = vsel %vm602_vm2, %v2279_v30, 0.0 }
 0x296   : > { %1321 = vadd.xlane.f32.xlu0 %v1320_v12  ;;  %v1770_v20 = vpop.eup %1769  ;;  %v690_v18 = vmul.f32 %v1768_v6, %v2167_v29  ;;  %v1283_v29 = vpop.xlane.xlu0 %1282 }
 0x297   : > { %v2286_v32 = vpop.eup %1771  ;;  %v689_v27 = vmul.f32 %v1770_v20, %v2140_v5  ;;  %v1295_v38 = vsub.f32 %v2165_v0, %v1283_v29 }
 0x298   : > { %v1280_v28 = vpop.xlane.xlu2 %1279  ;;  %v1098_v61 = vsel %vm602_vm2, %v2286_v32, 0.0  ;;  %v2295_v36 = vpop.eup %1773 }
 0x299   : > { %v1294_v39 = vsub.f32 %v2159_v24, %v1280_v28  ;;  %v694_v43 = vpack.c.bf16 %v690_v18, %v689_v27  ;;  %v1101_v5 = vsel %vm602_vm2, %v2295_v36, 0.0  ;;  %v1308_v24 = vmul.f32 1.442695, %v1295_v38 }
 0x29b   : > { %v1306_v58 = vmul.f32 1.442695, %v1294_v39 }
 0x29d   : > { %1653 = vmatmul.msk.bf16.gmra.mxu1 %vm602_vm2, %v694_v43  ;;  %1775 = vpow2.f32 %v1306_v58 }
 0x29e   : > { %1099 = vadd.xlane.f32.xlu0 %v1098_v61  ;;  %1127 = vrot.lane.b32.xlu1 %v2004_v34, %s1847_s19  ;;  %1777 = vpow2.f32 %v1308_v24 }
 0x2a0   : > { %v854_v54 = vpop.xlane.xlu2 %853 }
 0x2a3   : > { %v2302_v44 = vpop.eup %1775 }
 0x2a4   : > { %v1326_v40 = vsel %vm602_vm2, %v2302_v44, 0.0  ;;  %v2306_v45 = vpop.eup %1777 }
 0x2a5   : > { %1358 = vrot.lane.b32.xlu2 %v2004_v34, %s1846_s18  ;;  %v1329_v0 = vsel %vm602_vm2, %v2306_v45, 0.0  ;;  %v1304_v34 = vmul.f32 1.442695, %v1293_v41 }
 0x2a6   : > { %1102 = vadd.xlane.f32.xlu0 %v1101_v5 }
 0x2a7   : > { %1779 = vpow2.f32 %v1304_v34 }
 0x2a8   : > { %1781 = vrcp.f32 %v854_v54  ;;  %v1289_v1 = vpop.xlane.xlu2 %1288 }
 0x2a9   : > { %v1297_v15 = vsub.f32 %v2188_v51, %v1289_v1 }
 0x2ab   : > { %v1312_v2 = vmul.f32 1.442695, %v1297_v15 }
 0x2ad   : > { %v2314_v26 = vpop.eup %1779 }
 0x2ae   : > { %1327 = vadd.xlane.f32.xlu0 %v1326_v40  ;;  %v1782_v60 = vpop.eup %1781  ;;  %v1323_v63 = vsel %vm602_vm2, %v2314_v26, 0.0 }
 0x2af   : > { %v884_v62 = vmul.f32 %v1782_v60, %v2184_v48 }
 0x2b6   : > { %1330 = vadd.xlane.f32.xlu0 %v1329_v0 }
 0x2c0   : > { %v857_v47 = vpop.xlane.xlu0 %856 }
 0x2c1   : > { %1783 = vrcp.f32 %v857_v47  ;;  %v2323_v22 = vpop.xlane.xlu1 %1087 }
 0x2c2   : > { %1785 = vpow2.f32 %v1075_v59 }
 0x2c3   : > { %1787 = vpow2.f32 %v1310_v16 }
 0x2c7   : > { %v1784_v14 = vpop.eup %1783 }
 0x2c8   : > { %v885_v42 = vmul.f32 %v1784_v14, %v2195_v7  ;;  %v1058_v33 = vpop.xlane.xlu0 %1057  ;;  %1324 = vadd.xlane.f32.xlu1 %v1323_v63  ;;  %v2321_v8 = vpop.eup %1785 }
 0x2c9   : > { %v1066_v10 = vsub.f32 %v2206_v25, %v1058_v33  ;;  %v2327_v48 = vpop.eup %1787  ;;  %v1095_v7 = vsel %vm602_vm2, %v2321_v8, 0.0  ;;  %v860_v51 = vpop.xlane.xlu1 %859 }
 0x2ca   : > { %v892_v35 = vpack.c.bf16 %v885_v42, %v884_v62  ;;  %v1332_v25 = vsel %vm602_vm2, %v2327_v48, 0.0 }
 0x2cb   : > { %v1081_v19 = vmul.f32 1.442695, %v1066_v10 }
 0x2cc   : > { %1658 = vmatmul.msk.bf16.vlgmr.msrb.gmra.mxu0 %vm602_vm2, %v892_v35 }
 0x2cd   : > { %1789 = vpow2.f32 %v1081_v19 }
 0x2ce   : > { %1096 = vadd.xlane.f32.xlu2 %v1095_v7  ;;  %1791 = vpow2.f32 %v1312_v2 }
 0x2cf   : > { %1793 = vrcp.f32 %v860_v51 }
 0x2d0   : > { %1333 = vadd.xlane.f32.xlu1 %v1332_v25  ;;  %v1085_v23 = vpop.xlane.xlu0 %1084 }
 0x2d1   : > { %v722_v4 = vpop.f32.mrf.mxu1 }
 0x2d2   : > { %742 = vst.msk [vmem:[#allocation2] sm:$0xff] %vm557_vm1, %v722_v4 }
 0x2d3   : > { %v2334_v50 = vpop.eup %1789 }
 0x2d4   : > { %v1104_v6 = vsel %vm602_vm2, %v2334_v50, 0.0  ;;  %v2338_v20 = vpop.eup %1791 }
 0x2d5   : > { %1105 = vadd.xlane.f32.xlu0 %v1104_v6  ;;  %v1335_v28 = vsel %vm602_vm2, %v2338_v20, 0.0  ;;  %v1794_v27 = vpop.eup %1793 }
 0x2d6   : > { %v886_v43 = vmul.f32 %v1794_v27, %v2208_v31 }
 0x2d8   : > { %v863_v12 = vpop.xlane.xlu2 %862 }
 0x2d9   : > { %1795 = vrcp.f32 %v863_v12  ;;  %v724_v18 = vpop.f32.mrf.mxu1 }
 0x2da   : > { %743 = vst.msk [vmem:[#allocation2 + $0x8] sm:$0xff] %vm557_vm1, %v724_v18 }
 0x2dd   : > { %1336 = vadd.xlane.f32.xlu0 %v1335_v28 }
 0x2df   : > { %v1796_v39 = vpop.eup %1795 }
 0x2e0   : > { %v887_v61 = vmul.f32 %v1796_v39, %v2224_v57  ;;  %v869_v58 = vpop.xlane.xlu2 %868  ;;  %v866_v29 = vpop.xlane.xlu0 %865 }
 0x2e1   : > { %1797 = vrcp.f32 %v869_v58 }
 0x2e2   : > { %v893_v38 = vpack.c.bf16 %v887_v61, %v886_v43  ;;  %1799 = vrcp.f32 %v866_v29 }
 0x2e4   : > { %1659 = vmatmul.msk.bf16.gmra.mxu0 %vm602_vm2, %v893_v38 }
 0x2e7   : > { %v1798_v24 = vpop.eup %1797 }
 0x2e8   : > { %v872_v5 = vpop.xlane.xlu0 %871  ;;  %v1800_v40 = vpop.eup %1799  ;;  %v889_v41 = vmul.f32 %v1798_v24, %v2230_v52 }
 0x2e9   : > { %v888_v0 = vmul.f32 %v1800_v40, %v2235_v21  ;;  %1801 = vrcp.f32 %v872_v5 }
 0x2eb   : > { %v894_v49 = vpack.c.bf16 %v889_v41, %v888_v0 }
 0x2ef   : > { %v1802_v54 = vpop.eup %1801 }
 0x2f0   : > { %v1091_v34 = vpop.xlane.xlu0 %1090  ;;  %v890_v47 = vmul.f32 %v1802_v54, %v2242_v17 }
 0x2f4   : > { %1660 = vmatmul.msk.bf16.gmra.mxu0 %vm602_vm2, %v894_v49 }
 0x2f8   : > { %v875_v31 = vpop.xlane.xlu1 %874  ;;  %v1094_v57 = vpop.xlane.xlu0 %1093 }
 0x2f9   : > { %1803 = vrcp.f32 %v875_v31 }
 0x2fa   : > { %v727_v53 = vpop.f32.mrf.mxu1 }
 0x2fb   : > { %744 = vst.msk [vmem:[#allocation2 + $0x10] sm:$0xff] %vm557_vm1, %v727_v53 }
 0x2ff   : > { %v1804_v55 = vpop.eup %1803 }
 0x300   : > { %v1316_v59 = vpop.xlane.xlu2 %1315  ;;  %v891_v21 = vmul.f32 %v1804_v55, %v2259_v56 }
 0x301   : > { %v1319_v16 = vpop.xlane.xlu0 %1318  ;;  %1805 = vrcp.f32 %v1316_v59 }
 0x302   : > { %v895_v52 = vpack.c.bf16 %v891_v21, %v890_v47  ;;  %v729_v60 = vpop.f32.mrf.mxu1  ;;  %1807 = vrcp.f32 %v1319_v16 }
 0x303   : > { %745 = vst.msk [vmem:[#allocation2 + $0x18] sm:$0xff] %vm557_vm1, %v729_v60  ;;  %1809 = vrcp.f32 %v1085_v23 }
 0x304   : > { %1661 = vmatmul.msk.bf16.gmra.mxu0 %vm602_vm2, %v895_v52  ;;  %1811 = vrcp.f32 %v2323_v22 }
 0x305   : > { %1813 = vrcp.f32 %v1094_v57 }
 0x306   : > { %1815 = vrcp.f32 %v1091_v34 }
 0x307   : > { %v1806_v62 = vpop.eup %1805 }
 0x308   : > { %v1359_v14 = vpop.permute.xlu2 %1358  ;;  %v1808_v1 = vpop.eup %1807  ;;  %v1346_v63 = vmul.f32 %v1806_v62, %v2268_v3 }
 0x309   : > { %1380 = vmatpush.bf16.msra.mxu0 %v1359_v14  ;;  %v1810_v17 = vpop.eup %1809  ;;  %v1347_v33 = vmul.f32 %v1808_v1, %v2270_v9  ;;  %v1322_v3 = vpop.xlane.xlu0 %1321 }
 0x30a   : > { %v732_v42 = vpop.f32.mrf.mxu1  ;;  %v1812_v56 = vpop.eup %1811  ;;  %v1115_v10 = vmul.f32 %v1810_v17, %v2215_v13  ;;  %1817 = vrcp.f32 %v1322_v3 }
 0x30b   : > { %746 = vst.msk [vmem:[#allocation2 + $0x20] sm:$0xff] %vm557_vm1, %v732_v42  ;;  %v1116_v35 = vmul.f32 %v1812_v56, %v2198_v11  ;;  %v1354_v19 = vpack.c.bf16 %v1347_v33, %v1346_v63  ;;  %v1814_v9 = vpop.eup %1813 }
 0x30c   : > { %v1816_v13 = vpop.eup %1815  ;;  %v1118_v11 = vmul.f32 %v1814_v9, %v2256_v46 }
 0x30d   : > { %v1123_v7 = vpack.c.bf16 %v1116_v35, %v1115_v10  ;;  %v1117_v25 = vmul.f32 %v1816_v13, %v2248_v37 }
 0x30f   : > { %v1124_v51 = vpack.c.bf16 %v1118_v11, %v1117_v25  ;;  %v416_v11 = vld [vmem:[%s2512_s8 + $0x10] sm:$0xff]  ;;  %v417_v25 = vld [vmem:[%s2512_s8 + $0x18] sm:$0xff] }
 0x310   : > { %v1128_v15 = vpop.permute.xlu1 %1127  ;;  %v1818_v28 = vpop.eup %1817 }
 0x311   : > { %1149 = vmatpush.bf16.msrb.mxu1 %v1128_v15  ;;  %v1100_v6 = vpop.xlane.xlu0 %1099  ;;  %v1348_v37 = vmul.f32 %v1818_v28, %v2279_v30 }
 0x312   : > { %v734_v22 = vpop.f32.mrf.mxu1 }
 0x313   : > { %747 = vst.msk [vmem:[#allocation2 + $0x28] sm:$0xff] %vm557_vm1, %v734_v22 }
 0x314   : > { %1674 = vmatmul.msk.bf16.vlgmr.msra.gmra.mxu0 %vm602_vm2, %v1354_v19  ;;  %1666 = vmatmul.msk.bf16.vlgmr.msrb.gmra.mxu1 %vm602_vm2, %v1123_v7 }
 0x319   : > { %v1103_v12 = vpop.xlane.xlu0 %1102 }
 0x31a   : > { %v737_v2 = vpop.f32.mrf.mxu1 }
 0x31b   : > { %748 = vst.msk [vmem:[#allocation2 + $0x30] sm:$0xff] %vm557_vm1, %v737_v2 }
 0x321   : > { %v1328_v23 = vpop.xlane.xlu0 %1327 }
 0x322   : > { %v739_v4 = vpop.f32.mrf.mxu1 }
 0x323   : > { %749 = vst.msk [vmem:[#allocation2 + $0x38] sm:$0xff] %vm557_vm1, %v739_v4  ;;  %v414_v4 = vld [vmem:[%s2512_s8] sm:$0xff] }
 0x324   : > { %1667 = vmatmul.msk.bf16.gmra.mxu1 %vm602_vm2, %v1124_v51  ;;  %v1444_v51 = vpack.c.bf16 %v417_v25, %v416_v11 }
 0x326   : > { %1478 = vmatpush.bf16.msra.mxu3 %v1444_v51  ;;  %1531 = vmatpush.bf16.msra.mxu1 %v1444_v51 }
 0x329   : > { %v1331_v46 = vpop.xlane.xlu0 %1330 }
 0x33b   : > { %v1325_v18 = vpop.xlane.xlu1 %1324 }
 0x33c   : > { %1819 = vrcp.f32 %v1325_v18 }
 0x33d   : > { %1821 = vrcp.f32 %v1100_v6  ;;  %v415_v6 = vld [vmem:[%s2512_s8 + $0x8] sm:$0xff] }
 0x341   : > { %v1097_v27 = vpop.xlane.xlu2 %1096 }
 0x342   : > { %1823 = vrcp.f32 %v1097_v27  ;;  %v1820_v39 = vpop.eup %1819 }
 0x343   : > { %v1349_v43 = vmul.f32 %v1820_v39, %v2314_v26  ;;  %v1822_v61 = vpop.eup %1821  ;;  %1825 = vrcp.f32 %v1331_v46  ;;  %v1334_v54 = vpop.xlane.xlu1 %1333 }
 0x344   : > { %v1120_v24 = vmul.f32 %v1822_v61, %v2286_v32  ;;  %1827 = vrcp.f32 %v1328_v23 }
 0x345   : > { %v1355_v58 = vpack.c.bf16 %v1349_v43, %v1348_v37 }
 0x347   : > { %1675 = vmatmul.msk.bf16.gmra.mxu0 %vm602_vm2, %v1355_v58 }
 0x348   : > { %v1824_v29 = vpop.eup %1823  ;;  %v1106_v40 = vpop.xlane.xlu0 %1105 }
 0x349   : > { %v920_v38 = vpop.f32.mrf.mxu0  ;;  %v1119_v5 = vmul.f32 %v1824_v29, %v2321_v8  ;;  %1829 = vrcp.f32 %v1106_v40  ;;  %v1826_v30 = vpop.eup %1825 }
 0x34a   : > { %948 = vrot.lane.b32.xlu2 %v920_v38, %s1848_s22  ;;  %1831 = vrcp.f32 %v1103_v12  ;;  %v1828_v26 = vpop.eup %1827  ;;  %v1351_v34 = vmul.f32 %v1826_v30, %v2306_v45  ;;  %v1443_v12 = vpack.c.bf16 %v415_v6, %v414_v4  ;;  %v392_v30 = vld [vmem:[%s1947_s17 + $0x58] sm:$0xff] }
 0x34b   : > { %v1125_v0 = vpack.c.bf16 %v1120_v24, %v1119_v5  ;;  %v1350_v32 = vmul.f32 %v1828_v26, %v2302_v44  ;;  %v389_v5 = vld [vmem:[%s1947_s17 + $0x40] sm:$0xff]  ;;  %v390_v24 = vld [vmem:[%s1947_s17 + $0x48] sm:$0xff] }
 0x34c   : > { %1479 = vmatpush.bf16.msra.mxu3 %v1443_v12  ;;  %1532 = vmatpush.bf16.msra.mxu1 %v1443_v12  ;;  %v1509_v40 = vpack.c.bf16 %v390_v24, %v389_v5 }
 0x34d   : > { %1668 = vmatmul.msk.bf16.gmra.mxu1 %vm602_vm2, %v1125_v0  ;;  %v1356_v57 = vpack.c.bf16 %v1351_v34, %v1350_v32  ;;  %v391_v0 = vld [vmem:[%s1947_s17 + $0x50] sm:$0xff]  ;;  %v394_v32 = vld [vmem:[%s1947_s17 + $0x68] sm:$0xff] }
 0x34e   : > { %v1510_v26 = vpack.c.bf16 %v392_v30, %v391_v0 }
 0x34f   : > { %v1830_v8 = vpop.eup %1829 }
 0x350   : > { %v1832_v49 = vpop.eup %1831  ;;  %v1337_v31 = vpop.xlane.xlu0 %1336  ;;  %v1122_v53 = vmul.f32 %v1830_v8, %v2334_v50  ;;  %v393_v8 = vld [vmem:[%s1947_s17 + $0x60] sm:$0xff] }
 0x351   : > { %v922_v41 = vpop.f32.mrf.mxu0  ;;  %1833 = vrcp.f32 %v1337_v31  ;;  %v1121_v55 = vmul.f32 %v1832_v49, %v2295_v36  ;;  %v1511_v31 = vpack.c.bf16 %v394_v32, %v393_v8 }
 0x352   : > { %950 = vrot.lane.b32.xlu1 %v922_v41, %s1848_s22  ;;  %1835 = vrcp.f32 %v1334_v54  ;;  %v395_v54 = vld [vmem:[%s1947_s17 + $0x70] sm:$0xff] }
 0x353   : > { %v1126_v59 = vpack.c.bf16 %v1122_v53, %v1121_v55  ;;  %v396_v55 = vld [vmem:[%s1947_s17 + $0x78] sm:$0xff] }
 0x357   : > { %1676 = vmatmul.msk.bf16.gmra.mxu0 %vm602_vm2, %v1356_v57  ;;  %v1834_v47 = vpop.eup %1833 }
 0x358   : > { %v1836_v45 = vpop.eup %1835  ;;  %v1353_v44 = vmul.f32 %v1834_v47, %v2338_v20 }
 0x359   : > { %v1352_v16 = vmul.f32 %v1836_v45, %v2327_v48 }
 0x35b   : > { %v1357_v52 = vpack.c.bf16 %v1353_v44, %v1352_v16  ;;  %v1512_v44 = vpack.c.bf16 %v396_v55, %v395_v54 }
 0x35d   : > { %1669 = vmatmul.msk.bf16.gmra.mxu1 %vm602_vm2, %v1126_v59 }
 0x361   : > { %v925_v21 = vpop.f32.mrf.mxu0 }
 0x367   : > { %1677 = vmatmul.msk.bf16.gmra.mxu0 %vm602_vm2, %v1357_v52 }
 0x369   : > { %v927_v50 = vpop.f32.mrf.mxu0 }
 0x36d   : > { %1682 = vmatmul.msk.bf16.vlgmr.msra.gmra.mxu1 %vm429_vm0, %v1509_v40 }
 0x371   : > { %v930_v60 = vpop.f32.mrf.mxu0 }
 0x379   : > { %v932_v14 = vpop.f32.mrf.mxu0 }
 0x37d   : > { %1683 = vmatmul.msk.bf16.gmra.mxu1 %vm429_vm0, %v1510_v26 }
 0x381   : > { %v935_v62 = vpop.f32.mrf.mxu0 }
 0x389   : > { %v937_v1 = vpop.f32.mrf.mxu0 }
 0x38d   : > { %1684 = vmatmul.msk.bf16.gmra.mxu1 %vm429_vm0, %v1511_v31 }
 0x391   : > { %v1382_v36 = vpop.f32.mrf.mxu0  ;;  %v1151_v42 = vpop.f32.mrf.mxu1 }
 0x392   : > { %1179 = vrot.lane.b32.xlu0 %v1151_v42, %s1849_s23 }
 0x399   : > { %v1384_v17 = vpop.f32.mrf.mxu0  ;;  %v1153_v56 = vpop.f32.mrf.mxu1 }
 0x39a   : > { %1412 = vrot.lane.b32.xlu1 %v1384_v17, %s1850_s24  ;;  %1181 = vrot.lane.b32.xlu2 %v1153_v56, %s1849_s23 }
 0x39b   : > { %1410 = vrot.lane.b32.xlu0 %v1382_v36, %s1850_s24 }
 0x39d   : > { %1685 = vmatmul.msk.bf16.gmra.mxu1 %vm429_vm0, %v1512_v44 }
 0x3a1   : > { %v1156_v48 = vpop.f32.mrf.mxu1 }
 0x3a2   : > { %952 = vrot.lane.b32.xlu2 %v925_v21, %s1848_s22  ;;  %1183 = vrot.lane.b32.xlu1 %v1156_v48, %s1849_s23 }
 0x3a3   : > { %954 = vrot.lane.b32.xlu0 %v927_v50, %s1848_s22 }
 0x3a4   : > { %v949_v20 = vpop.permute.xlu2 %948 }
 0x3a5   : > { %973 = vst.msk [vmem:[#allocation2] sm:$0xff] %vm972_vm3, %v949_v20 }
 0x3a9   : > { %v1158_v63 = vpop.f32.mrf.mxu1 }
 0x3aa   : > { %1185 = vrot.lane.b32.xlu2 %v1158_v63, %s1849_s23 }
 0x3b2   : > { %956 = vrot.lane.b32.xlu2 %v930_v60, %s1848_s22 }
 0x3c4   : > { %v951_v33 = vpop.permute.xlu1 %950  ;;  %v1387_v10 = vpop.f32.mrf.mxu0 }
 0x3c5   : > { %974 = vst.msk [vmem:[#allocation2 + $0x8] sm:$0xff] %vm972_vm3, %v951_v33  ;;  %1414 = vrot.lane.b32.xlu0 %v1387_v10, %s1850_s24  ;;  %v1708_v33 = vld [vmem:[%s2513_s9] ss:$0 sm:$0xff] }
 0x3ca   : > { %v1161_v35 = vpop.f32.mrf.mxu1 }
 0x3cc   : > { %v1389_v15 = vpop.f32.mrf.mxu0 }
 0x3cd   : > { %958 = vrot.lane.b32.xlu0 %v932_v14, %s1848_s22  ;;  %1416 = vrot.lane.b32.xlu1 %v1389_v15, %s1850_s24 }
 0x3d2   : > { %v1163_v19 = vpop.f32.mrf.mxu1 }
 0x3d3   : > { %1189 = vrot.lane.b32.xlu2 %v1163_v19, %s1849_s23 }
 0x3d4   : > { %v1392_v22 = vpop.f32.mrf.mxu0 }
 0x3d5   : > { %1187 = vrot.lane.b32.xlu1 %v1161_v35, %s1849_s23  ;;  %1418 = vrot.lane.b32.xlu0 %v1392_v22, %s1850_s24 }
 0x3da   : > { %v1166_v7 = vpop.f32.mrf.mxu1 }
 0x3db   : > { %960 = vrot.lane.b32.xlu2 %v935_v62, %s1848_s22 }
 0x3dc   : > { %v1394_v3 = vpop.f32.mrf.mxu0 }
 0x3dd   : > { %962 = vrot.lane.b32.xlu0 %v937_v1, %s1848_s22  ;;  %1420 = vrot.lane.b32.xlu1 %v1394_v3, %s1850_s24 }
 0x3e2   : > { %v1168_v2 = vpop.f32.mrf.mxu1 }
 0x3e3   : > { %1193 = vrot.lane.b32.xlu2 %v1168_v2, %s1849_s23 }
 0x3e4   : > { %v1397_v9 = vpop.f32.mrf.mxu0 }
 0x3e5   : > { %1191 = vrot.lane.b32.xlu1 %v1166_v7, %s1849_s23  ;;  %1422 = vrot.lane.b32.xlu0 %v1397_v9, %s1850_s24 }
 0x3ea   : > { %v1534_v63 = vpop.f32.mrf.mxu1 }
 0x3eb   : > { %v1535_v19 = vadd.f32 %v1708_v33, %v1534_v63 }
 0x3ec   : > { %v1399_v13 = vpop.f32.mrf.mxu0 }
 0x3ed   : > { %1424 = vrot.lane.b32.xlu1 %v1399_v13, %s1850_s24  ;;  %1554 = vst.msk [vmem:[%s2467_s20 + $0x40] sm:$0xff] %vm429_vm0, %v1535_v19 }
 0x3f2   : > { %v1536_v15 = vpop.f32.mrf.mxu1 }
 0x3f3   : > { %v1537_v22 = vadd.f32 %v1708_v33, %v1536_v15 }
 0x3f4   : > { %v1182_v23 = vpop.permute.xlu2 %1181 }
 0x3f5   : > { %1205 = vst.msk [vmem:[#allocation2 + $0x8] sm:$0xff] %vm1203_vm4, %v1182_v23 }
 0x3f6   : > { %1555 = vst.msk [vmem:[%s2467_s20 + $0x48] sm:$0xff] %vm429_vm0, %v1537_v22 }
 0x3fa   : > { %v1539_v2 = vpop.f32.mrf.mxu1 }
 0x3fb   : > { %v1540_v13 = vadd.f32 %v1708_v33, %v1539_v2 }
 0x3fc   : > { %v953_v18 = vpop.permute.xlu2 %952 }
 0x3fd   : > { %975 = vst.msk [vmem:[#allocation2 + $0x10] sm:$0xff] %vm972_vm3, %v953_v18 }
 0x3fe   : > { %1556 = vst.msk [vmem:[%s2467_s20 + $0x50] sm:$0xff] %vm429_vm0, %v1540_v13 }
 0x402   : > { %v1541_v9 = vpop.f32.mrf.mxu1 }
 0x403   : > { %v1542_v11 = vadd.f32 %v1708_v33, %v1541_v9 }
 0x404   : > { %v1186_v28 = vpop.permute.xlu2 %1185  ;;  %v1180_v27 = vpop.permute.xlu0 %1179 }
 0x405   : > { %1204 = vst.msk [vmem:[#allocation2] sm:$0xff] %vm1203_vm4, %v1180_v27 }
 0x406   : > { %1557 = vst.msk [vmem:[%s2467_s20 + $0x58] sm:$0xff] %vm429_vm0, %v1542_v11 }
 0x40a   : > { %v1544_v25 = vpop.f32.mrf.mxu1 }
 0x40b   : > { %v1545_v51 = vadd.f32 %v1708_v33, %v1544_v25 }
 0x40c   : > { %v1413_v39 = vpop.permute.xlu1 %1412  ;;  %v957_v46 = vpop.permute.xlu2 %956 }
 0x40d   : > { %1436 = vst.msk [vmem:[#allocation2 + $0x8] sm:$0xff] %vm1434_vm5, %v1413_v39  ;;  %v1411_v37 = vpop.permute.xlu0 %1410 }
 0x40e   : > { %977 = vst.msk [vmem:[#allocation2 + $0x20] sm:$0xff] %vm972_vm3, %v957_v46 }
 0x40f   : > { %1435 = vst.msk [vmem:[#allocation2] sm:$0xff] %vm1434_vm5, %v1411_v37 }
 0x410   : > { %1558 = vst.msk [vmem:[%s2467_s20 + $0x60] sm:$0xff] %vm429_vm0, %v1545_v51 }
 0x412   : > { %v1546_v4 = vpop.f32.mrf.mxu1 }
 0x413   : > { %v1547_v6 = vadd.f32 %v1708_v33, %v1546_v4 }
 0x414   : > { %v1446_v43 = vld [vmem:[#allocation2 + $0x8] sm:$0xff]  ;;  %v1184_v58 = vpop.permute.xlu1 %1183 }
 0x415   : > { %v955_v61 = vpop.permute.xlu0 %954  ;;  %1206 = vst.msk [vmem:[#allocation2 + $0x10] sm:$0xff] %vm1203_vm4, %v1184_v58 }
 0x416   : > { %976 = vst.msk [vmem:[#allocation2 + $0x18] sm:$0xff] %vm972_vm3, %v955_v61  ;;  %v1445_v29 = vld [vmem:[#allocation2] sm:$0xff] }
 0x417   : > { %v1453_v38 = vpack.c.bf16 %v1446_v43, %v1445_v29  ;;  %1207 = vst.msk [vmem:[#allocation2 + $0x18] sm:$0xff] %vm1203_vm4, %v1186_v28 }
 0x418   : > { %1559 = vst.msk [vmem:[%s2467_s20 + $0x68] sm:$0xff] %vm429_vm0, %v1547_v6 }
 0x419   : > { %1678 = vmatmul.msk.bf16.vlgmr.msra.gmra.mxu3 %vm429_vm0, %v1453_v38 }
 0x41a   : > { %v1549_v12 = vpop.f32.mrf.mxu1 }
 0x41b   : > { %v1550_v27 = vadd.f32 %v1708_v33, %v1549_v12 }
 0x41d   : > { %1560 = vst.msk [vmem:[%s2467_s20 + $0x70] sm:$0xff] %vm429_vm0, %v1550_v27 }
 0x422   : > { %v1551_v28 = vpop.f32.mrf.mxu1 }
 0x423   : > { %v1552_v39 = vadd.f32 %v1708_v33, %v1551_v28 }
 0x425   : > { %1561 = vst.msk [vmem:[%s2467_s20 + $0x78] sm:$0xff] %vm429_vm0, %v1552_v39 }
 0x42d   : > { %v1190_v41 = vpop.permute.xlu2 %1189 }
 0x435   : > { %v961_v34 = vpop.permute.xlu2 %960 }
 0x436   : > { %979 = vst.msk [vmem:[#allocation2 + $0x30] sm:$0xff] %vm972_vm3, %v961_v34 }
 0x437   : > { %v1415_v49 = vpop.permute.xlu0 %1414 }
 0x438   : > { %1437 = vst.msk [vmem:[#allocation2 + $0x10] sm:$0xff] %vm1434_vm5, %v1415_v49 }
 0x43d   : > { %v1194_v60 = vpop.permute.xlu2 %1193 }
 0x43f   : > { %v1417_v57 = vpop.permute.xlu1 %1416  ;;  %v959_v53 = vpop.permute.xlu0 %958  ;;  %v1447_v45 = vld [vmem:[#allocation2 + $0x10] sm:$0xff] }
 0x440   : > { %1438 = vst.msk [vmem:[#allocation2 + $0x18] sm:$0xff] %vm1434_vm5, %v1417_v57 }
 0x441   : > { %978 = vst.msk [vmem:[#allocation2 + $0x28] sm:$0xff] %vm972_vm3, %v959_v53 }
 0x442   : > { %1209 = vst.msk [vmem:[#allocation2 + $0x28] sm:$0xff] %vm1203_vm4, %v1190_v41 }
 0x447   : > { %v1188_v59 = vpop.permute.xlu1 %1187  ;;  %v1419_v47 = vpop.permute.xlu0 %1418  ;;  %v1448_v21 = vld [vmem:[#allocation2 + $0x18] sm:$0xff] }
 0x448   : > { %1208 = vst.msk [vmem:[#allocation2 + $0x20] sm:$0xff] %vm1203_vm4, %v1188_v59  ;;  %v1454_v16 = vpack.c.bf16 %v1448_v21, %v1447_v45 }
 0x449   : > { %1439 = vst.msk [vmem:[#allocation2 + $0x20] sm:$0xff] %vm1434_vm5, %v1419_v47 }
 0x44a   : > { %1679 = vmatmul.msk.bf16.gmra.mxu3 %vm429_vm0, %v1454_v16 }
 0x44f   : > { %v1421_v52 = vpop.permute.xlu1 %1420  ;;  %v963_v50 = vpop.permute.xlu0 %962 }
 0x450   : > { %1440 = vst.msk [vmem:[#allocation2 + $0x28] sm:$0xff] %vm1434_vm5, %v1421_v52  ;;  %v1449_v1 = vld [vmem:[#allocation2 + $0x20] sm:$0xff] }
 0x451   : > { %980 = vst.msk [vmem:[#allocation2 + $0x38] sm:$0xff] %vm972_vm3, %v963_v50 }
 0x452   : > { %1211 = vst.msk [vmem:[#allocation2 + $0x38] sm:$0xff] %vm1203_vm4, %v1194_v60 }
 0x457   : > { %v1192_v14 = vpop.permute.xlu1 %1191  ;;  %v1423_v62 = vpop.permute.xlu0 %1422  ;;  %v1450_v36 = vld [vmem:[#allocation2 + $0x28] sm:$0xff] }
 0x458   : > { %1210 = vst.msk [vmem:[#allocation2 + $0x30] sm:$0xff] %vm1203_vm4, %v1192_v14  ;;  %v1455_v42 = vpack.c.bf16 %v1450_v36, %v1449_v1 }
 0x459   : > { %1441 = vst.msk [vmem:[#allocation2 + $0x30] sm:$0xff] %vm1434_vm5, %v1423_v62 }
 0x45a   : > { %1680 = vmatmul.msk.bf16.gmra.mxu3 %vm429_vm0, %v1455_v42 }
 0x45f   : > { %v1425_v17 = vpop.permute.xlu1 %1424 }
 0x460   : > { %1442 = vst.msk [vmem:[#allocation2 + $0x38] sm:$0xff] %vm1434_vm5, %v1425_v17  ;;  %v1451_v56 = vld [vmem:[#allocation2 + $0x30] sm:$0xff] }
 0x467   : > { %v1452_v48 = vld [vmem:[#allocation2 + $0x38] sm:$0xff] }
 0x468   : > { %v1456_v20 = vpack.c.bf16 %v1452_v48, %v1451_v56 }
 0x46a   : > { %1681 = vmatmul.msk.bf16.gmra.mxu3 %vm429_vm0, %v1456_v20 }
 0x49c   : > { %v1481_v10 = vpop.f32.mrf.mxu3 }
 0x49d   : > { %v1482_v35 = vadd.f32 %v1708_v33, %v1481_v10 }
 0x49f   : > { %1501 = vst.msk [vmem:[%s2467_s20] sm:$0xff] %vm429_vm0, %v1482_v35 }
 0x4a4   : > { %v1483_v7 = vpop.f32.mrf.mxu3 }
 0x4a5   : > { %v1484_v3 = vadd.f32 %v1708_v33, %v1483_v7 }
 0x4a7   : > { %1502 = vst.msk [vmem:[%s2467_s20 + $0x8] sm:$0xff] %vm429_vm0, %v1484_v3 }
 0x4cd   : > { %v1486_v23 = vpop.f32.mrf.mxu3 }
 0x4ce   : > { %v1487_v18 = vadd.f32 %v1708_v33, %v1486_v23 }
 0x4d0   : > { %1503 = vst.msk [vmem:[%s2467_s20 + $0x10] sm:$0xff] %vm429_vm0, %v1487_v18 }
 0x4d5   : > { %v1488_v46 = vpop.f32.mrf.mxu3 }
 0x4d6   : > { %v1489_v37 = vadd.f32 %v1708_v33, %v1488_v46 }
 0x4d8   : > { %1504 = vst.msk [vmem:[%s2467_s20 + $0x18] sm:$0xff] %vm429_vm0, %v1489_v37 }
 0x4dd   : > { %v1491_v43 = vpop.f32.mrf.mxu3 }
 0x4de   : > { %v1492_v61 = vadd.f32 %v1708_v33, %v1491_v43 }
 0x4e0   : > { %1505 = vst.msk [vmem:[%s2467_s20 + $0x20] sm:$0xff] %vm429_vm0, %v1492_v61 }
 0x4e5   : > { %v1493_v58 = vpop.f32.mrf.mxu3 }
 0x4e6   : > { %v1494_v29 = vadd.f32 %v1708_v33, %v1493_v58 }
 0x4e8   : > { %1506 = vst.msk [vmem:[%s2467_s20 + $0x28] sm:$0xff] %vm429_vm0, %v1494_v29 }
 0x4ed   : > { %v1496_v38 = vpop.f32.mrf.mxu3 }
 0x4ee   : > { %v1497_v5 = vadd.f32 %v1708_v33, %v1496_v38 }
 0x4f0   : > { %1507 = vst.msk [vmem:[%s2467_s20 + $0x30] sm:$0xff] %vm429_vm0, %v1497_v5 }
 0x4f5   : > { %v1498_v24 = vpop.f32.mrf.mxu3 }
 0x4f6   : > { %v1499_v40 = vadd.f32 %v1708_v33, %v1498_v24 }
 0x4f8   : > { %1508 = vst.msk [vmem:[%s2467_s20 + $0x38] sm:$0xff] %vm429_vm0, %v1499_v40 }
 0x4f9 PF: > { %s20_s13 = sadd.s32 1, %s1843_s13  }
 0x4fa   : > { %p17_p4 = scmp.ge.s32.totalorder %s20_s13, 4  }
 0x4fc   :  { %19 = sbr.rel (!%p17_p4) target bundleno = 1 (0x1), region = 93 }

</bundles_post_ra>
